<compile_context>
chip_gen: v7x
topology: tpu7x:2x2x1
jax: 0.10.0
libtpu: 0.0.40
codegen_flags: <defaults>
</compile_context>

<pallas_src>
import functools
import math

import jax
import jax.numpy as jnp
from jax import lax
from jax.experimental import pallas as pl
from jax.experimental.pallas import tpu as pltpu


# ----------------------------------------------------------------------------
# In-kernel helpers
# ----------------------------------------------------------------------------
def _layernorm_f32(x, w, b, eps):
    mean = jnp.mean(x, axis=-1, keepdims=True)
    var = jnp.mean((x - mean) ** 2, axis=-1, keepdims=True)
    return (x - mean) * lax.rsqrt(var + eps) * w[None, :] + b[None, :]


# ----------------------------------------------------------------------------
# Kernel 1: LayerNorm1 + QKV projection -> head-major bf16 q/k/v
# ----------------------------------------------------------------------------
def _qkv_kernel(x_ref, ln1_w_ref, ln1_b_ref, qkv_w_ref, qkv_b_ref,
                q_ref, k_ref, v_ref, *, num_heads, eps):
    x = x_ref[0]                              # (Tn, C) f32
    C = x.shape[-1]
    hd = C // num_heads
    scale = hd ** (-0.5)

    xn = _layernorm_f32(x, ln1_w_ref[0], ln1_b_ref[0], eps).astype(jnp.bfloat16)
    # (Tn, 3C) f32 accumulation on the MXU from bf16 operands.
    qkv = jnp.dot(xn, qkv_w_ref[...], preferred_element_type=jnp.float32)
    qkv = qkv + qkv_b_ref[0][None, :]

    # Split into head-major layout once here (one-time relayout per token tile)
    # so the flash kernel never slices along the lane dim.
    for h in range(num_heads):
        q_ref[0, h] = (qkv[:, h * hd:(h + 1) * hd] * scale).astype(jnp.bfloat16)
        k_ref[0, h] = qkv[:, C + h * hd:C + (h + 1) * hd].astype(jnp.bfloat16)
        v_ref[0, h] = qkv[:, 2 * C + h * hd:2 * C + (h + 1) * hd].astype(jnp.bfloat16)


# ----------------------------------------------------------------------------
# Kernel 2: flash attention (online softmax over kv tiles) + fused
#           output-projection / residual / LN2 / MLP epilogue.
# ----------------------------------------------------------------------------
def _attn_mlp_kernel(x_ref, q_ref, k_ref, v_ref,
                     proj_w_ref, proj_b_ref,
                     ln2_w_ref, ln2_b_ref,
                     fc1_w_ref, fc1_b_ref, fc2_w_ref, fc2_b_ref,
                     out_ref,
                     m_sc, l_sc, acc_sc,
                     *, num_heads, eps):
    ki = pl.program_id(2)

    @pl.when(ki == 0)
    def _init():
        m_sc[...] = jnp.full_like(m_sc, -jnp.inf)
        l_sc[...] = jnp.zeros_like(l_sc)
        acc_sc[...] = jnp.zeros_like(acc_sc)

    q = q_ref[0]                              # (H, Tq, hd) bf16, pre-scaled
    k = k_ref[0]                              # (H, Tk, hd) bf16
    v = v_ref[0]                              # (H, Tk, hd) bf16

    # Head-batched scores (f32 accumulation).
    s = jnp.einsum("hqd,hkd->hqk", q, k, preferred_element_type=jnp.float32)

    m_prev = m_sc[...]
    m_new = jnp.maximum(m_prev, jnp.max(s, axis=-1, keepdims=True))
    alpha = jnp.exp(m_prev - m_new)
    p = jnp.exp(s - m_new)
    l_sc[...] = alpha * l_sc[...] + jnp.sum(p, axis=-1, keepdims=True)
    acc_sc[...] = alpha * acc_sc[...] + jnp.einsum(
        "hqk,hkd->hqd", p.astype(v.dtype), v, preferred_element_type=jnp.float32)
    m_sc[...] = m_new

    @pl.when(ki == pl.num_programs(2) - 1)
    def _finalize():
        x = x_ref[0]                          # (Tq, C) f32 residual input
        Tq, C = x.shape

        # Normalize and fuse the output projection per head:
        #   attn_out = concat_h(o_h) @ W_proj  ==  sum_h o_h @ W_proj[h]
        o = acc_sc[...] * pl.reciprocal(l_sc[...], approx=True)   # (H, Tq, hd)
        o = o.astype(jnp.bfloat16)
        proj = jnp.zeros((Tq, C), jnp.float32)
        for h in range(num_heads):
            proj = proj + jnp.dot(o[h], proj_w_ref[h],
                                  preferred_element_type=jnp.float32)
        x1 = x + proj + proj_b_ref[0][None, :]        # residual 1 (f32)

        # LayerNorm2 + MLP (fc1 -> exact GELU -> fc2) + residual 2.
        xn2 = _layernorm_f32(x1, ln2_w_ref[0], ln2_b_ref[0], eps)
        xn2 = xn2.astype(jnp.bfloat16)
        h1 = jnp.dot(xn2, fc1_w_ref[...], preferred_element_type=jnp.float32)
        h1 = jax.nn.gelu(h1 + fc1_b_ref[0][None, :], approximate=False)
        h2 = jnp.dot(h1.astype(jnp.bfloat16), fc2_w_ref[...],
                     preferred_element_type=jnp.float32)
        out_ref[0] = x1 + h2 + fc2_b_ref[0][None, :]


# ----------------------------------------------------------------------------
# Wrapper
# ----------------------------------------------------------------------------
def _nbytes(shape, dtype):
    return math.prod(shape) * jnp.dtype(dtype).itemsize


def _vmem_limit(block_bytes, scratch_bytes=0):
    # 2x for double-buffered pipeline inputs/outputs, plus headroom; clamp to
    # [32 MiB, 64 MiB] so the limit is valid on v5e/v6e and v7x (64 MiB VMEM).
    est = 2 * sum(block_bytes) + scratch_bytes + (8 << 20)
    return int(min(max(est, 32 << 20), 64 << 20))


def vit_block(x, params, *, num_heads, eps=1e-5,
              tile_n=256, tile_q=256, tile_kv=256):
    """x: (B, N, C) float32. params: see init_params. Returns (B, N, C) f32."""
    B, N, C = x.shape
    assert C % num_heads == 0
    hd = C // num_heads
    hidden = params["fc1_w"].shape[1]

    Tn = min(tile_n, N)
    Tq = min(tile_q, N)
    Tk = min(tile_kv, N)
    assert N % Tn == 0 and N % Tq == 0 and N % Tk == 0, "N must divide tiles"

    bf = jnp.bfloat16
    qkv_w = params["qkv_w"].astype(bf)                       # (C, 3C)
    proj_wh = params["proj_w"].reshape(num_heads, hd, C).astype(bf)  # (H,hd,C)
    fc1_w = params["fc1_w"].astype(bf)                       # (C, hidden)
    fc2_w = params["fc2_w"].astype(bf)                       # (hidden, C)

    # ---------------- Kernel 1: LN1 + QKV projection ----------------
    k1_blocks = [
        _nbytes((1, Tn, C), jnp.float32),
        2 * _nbytes((1, C), jnp.float32),
        _nbytes((C, 3 * C), bf),
        _nbytes((1, 3 * C), jnp.float32),
        3 * _nbytes((1, num_heads, Tn, hd), bf),
    ]
    qkv_call = pl.pallas_call(
        functools.partial(_qkv_kernel, num_heads=num_heads, eps=eps),
        out_shape=(
            jax.ShapeDtypeStruct((B, num_heads, N, hd), bf),
            jax.ShapeDtypeStruct((B, num_heads, N, hd), bf),
            jax.ShapeDtypeStruct((B, num_heads, N, hd), bf),
        ),
        grid_spec=pltpu.PrefetchScalarGridSpec(
            num_scalar_prefetch=0,
            grid=(B, N // Tn),
            in_specs=[
                pl.BlockSpec((1, Tn, C), lambda b, t: (b, t, 0)),
                pl.BlockSpec((1, C), lambda b, t: (0, 0)),
                pl.BlockSpec((1, C), lambda b, t: (0, 0)),
                pl.BlockSpec((C, 3 * C), lambda b, t: (0, 0)),
                pl.BlockSpec((1, 3 * C), lambda b, t: (0, 0)),
            ],
            out_specs=(
                pl.BlockSpec((1, num_heads, Tn, hd), lambda b, t: (b, 0, t, 0)),
                pl.BlockSpec((1, num_heads, Tn, hd), lambda b, t: (b, 0, t, 0)),
                pl.BlockSpec((1, num_heads, Tn, hd), lambda b, t: (b, 0, t, 0)),
            ),
        ),
        compiler_params=pltpu.CompilerParams(
            dimension_semantics=("parallel", "parallel"),
            vmem_limit_bytes=_vmem_limit(k1_blocks)),
    )
    q, k, v = qkv_call(x, params["ln1_w"], params["ln1_b"], qkv_w,
                       params["qkv_b"])

    # -------- Kernel 2: flash attention + proj/LN2/MLP epilogue --------
    k2_blocks = [
        _nbytes((1, Tq, C), jnp.float32),
        _nbytes((1, num_heads, Tq, hd), bf),
        2 * _nbytes((1, num_heads, Tk, hd), bf),
        _nbytes((num_heads, hd, C), bf),
        4 * _nbytes((1, C), jnp.float32),
        _nbytes((C, hidden), bf),
        _nbytes((1, hidden), jnp.float32),
        _nbytes((hidden, C), bf),
        _nbytes((1, Tq, C), jnp.float32),
    ]
    k2_scratch = (2 * _nbytes((num_heads, Tq, 1), jnp.float32)
                  + _nbytes((num_heads, Tq, hd), jnp.float32)
                  + _nbytes((Tq, hidden), jnp.float32))

    out = pl.pallas_call(
        functools.partial(_attn_mlp_kernel, num_heads=num_heads, eps=eps),
        out_shape=jax.ShapeDtypeStruct((B, N, C), jnp.float32),
        grid_spec=pltpu.PrefetchScalarGridSpec(
            num_scalar_prefetch=0,
            grid=(B, N // Tq, N // Tk),
            in_specs=[
                pl.BlockSpec((1, Tq, C), lambda b, qi, ki: (b, qi, 0)),     # x
                pl.BlockSpec((1, num_heads, Tq, hd),
                             lambda b, qi, ki: (b, 0, qi, 0)),              # q
                pl.BlockSpec((1, num_heads, Tk, hd),
                             lambda b, qi, ki: (b, 0, ki, 0)),              # k
                pl.BlockSpec((1, num_heads, Tk, hd),
                             lambda b, qi, ki: (b, 0, ki, 0)),              # v
                pl.BlockSpec((num_heads, hd, C),
                             lambda b, qi, ki: (0, 0, 0)),                  # proj_w
                pl.BlockSpec((1, C), lambda b, qi, ki: (0, 0)),             # proj_b
                pl.BlockSpec((1, C), lambda b, qi, ki: (0, 0)),             # ln2_w
                pl.BlockSpec((1, C), lambda b, qi, ki: (0, 0)),             # ln2_b
                pl.BlockSpec((C, hidden), lambda b, qi, ki: (0, 0)),        # fc1_w
                pl.BlockSpec((1, hidden), lambda b, qi, ki: (0, 0)),        # fc1_b
                pl.BlockSpec((hidden, C), lambda b, qi, ki: (0, 0)),        # fc2_w
                pl.BlockSpec((1, C), lambda b, qi, ki: (0, 0)),             # fc2_b
            ],
            out_specs=pl.BlockSpec((1, Tq, C), lambda b, qi, ki: (b, qi, 0)),
            scratch_shapes=[
                pltpu.VMEM((num_heads, Tq, 1), jnp.float32),   # running max
                pltpu.VMEM((num_heads, Tq, 1), jnp.float32),   # running sum
                pltpu.VMEM((num_heads, Tq, hd), jnp.float32),  # accumulator
            ],
        ),
        compiler_params=pltpu.CompilerParams(
            dimension_semantics=("parallel", "parallel", "arbitrary"),
            vmem_limit_bytes=_vmem_limit(k2_blocks, k2_scratch)),
    )(x, q, k, v, proj_wh, params["proj_b"], params["ln2_w"], params["ln2_b"],
      fc1_w, params["fc1_b"], fc2_w, params["fc2_b"])
    return out


# ----------------------------------------------------------------------------
# Parameters + pure-JAX reference
# ----------------------------------------------------------------------------
def init_params(key, dim, num_heads, mlp_ratio=4.0):
    hidden = int(dim * mlp_ratio)
    ks = jax.random.split(key, 8)
    s = 0.02
    return {
        "ln1_w": jnp.ones((1, dim), jnp.float32),
        "ln1_b": jnp.zeros((1, dim), jnp.float32),
        "ln2_w": jnp.ones((1, dim), jnp.float32),
        "ln2_b": jnp.zeros((1, dim), jnp.float32),
        "qkv_w": s * jax.random.normal(ks[0], (dim, 3 * dim), jnp.float32),
        "qkv_b": s * jax.random.normal(ks[1], (1, 3 * dim), jnp.float32),
        "proj_w": s * jax.random.normal(ks[2], (dim, dim), jnp.float32),
        "proj_b": s * jax.random.normal(ks[3], (1, dim), jnp.float32),
        "fc1_w": s * jax.random.normal(ks[4], (dim, hidden), jnp.float32),
        "fc1_b": s * jax.random.normal(ks[5], (1, hidden), jnp.float32),
        "fc2_w": s * jax.random.normal(ks[6], (hidden, dim), jnp.float32),
        "fc2_b": s * jax.random.normal(ks[7], (1, dim), jnp.float32),
    }


def vit_block_ref(x, params, *, num_heads, eps=1e-5):
    """Pure-JAX f32 reference of the Block forward pass."""
    B, N, C = x.shape
    hd = C // num_heads
    scale = hd ** (-0.5)

    def ln(v, w, b):
        m = jnp.mean(v, axis=-1, keepdims=True)
        var = jnp.mean((v - m) ** 2, axis=-1, keepdims=True)
        return (v - m) / jnp.sqrt(var + eps) * w[0] + b[0]

    shortcut = x
    h = ln(x, params["ln1_w"], params["ln1_b"])
    qkv = h @ params["qkv_w"] + params["qkv_b"][0]
    qkv = qkv.reshape(B, N, 3, num_heads, hd).transpose(2, 0, 3, 1, 4)
    q, k, v = qkv[0], qkv[1], qkv[2]                      # (B, H, N, hd)
    attn = jnp.einsum("bhnd,bhmd->bhnm", q * scale, k)
    attn = jax.nn.softmax(attn, axis=-1)
    o = jnp.einsum("bhnm,bhmd->bhnd", attn, v)
    o = o.transpose(0, 2, 1, 3).reshape(B, N, C)
    o = o @ params["proj_w"] + params["proj_b"][0]
    x1 = shortcut + o
    h2 = ln(x1, params["ln2_w"], params["ln2_b"])
    h2 = h2 @ params["fc1_w"] + params["fc1_b"][0]
    h2 = jax.nn.gelu(h2, approximate=False)
    h2 = h2 @ params["fc2_w"] + params["fc2_b"][0]
    return x1 + h2


if __name__ == "__main__":
    B, C = 2, 32
    num_heads = 4          # head_dim = 8
    Hs, Ws = 8, 16
    N = Hs * Ws            # 128 tokens -> 2 q-tiles x 2 kv-tiles of 64

    key = jax.random.PRNGKey(0)
    kx, kp = jax.random.split(key)
    x = jax.random.normal(kx, (B, N, C), jnp.float32)
    params = init_params(kp, C, num_heads)

    out = vit_block(x, params, num_heads=num_heads,
                    tile_n=64, tile_q=64, tile_kv=64)
    out = jax.block_until_ready(out)

    ref = vit_block_ref(x, params, num_heads=num_heads)
    assert out.shape == (B, N, C)
    max_err = float(jnp.max(jnp.abs(out - ref)))
    assert max_err < 2e-2, max_err     # bf16 matmul tolerance
    print("KERNEL_OK")
</pallas_src>

<mosaic_0001>
module attributes {stable_mosaic.version = 11 : i64} {
  func.func @_qkv_kernel(%arg0: i32, %arg1: i32, %arg2: memref<1x64x32xf32, #tpu.memory_space<vmem>>, %arg3: memref<1x32xf32, #tpu.memory_space<vmem>>, %arg4: memref<1x32xf32, #tpu.memory_space<vmem>>, %arg5: memref<32x96xbf16, #tpu.memory_space<vmem>>, %arg6: memref<1x96xf32, #tpu.memory_space<vmem>>, %arg7: memref<1x4x64x8xbf16, #tpu.memory_space<vmem>>, %arg8: memref<1x4x64x8xbf16, #tpu.memory_space<vmem>>, %arg9: memref<1x4x64x8xbf16, #tpu.memory_space<vmem>>) attributes {dimension_semantics = [#tpu.dimension_semantics<parallel>, #tpu.dimension_semantics<parallel>], iteration_bounds = array<i64: 2, 2>, scalar_prefetch = 0 : i64, scratch_operands = 0 : i64, tpu.core_type = #tpu.core_type<tc>, window_params = [{transform_indices = @transform_0, window_bounds = array<i64: 1, 64, 32>}, {pipeline_mode = #tpu.pipeline_mode<synchronous>, transform_indices = @transform_1, window_bounds = array<i64: 1, 32>}, {pipeline_mode = #tpu.pipeline_mode<synchronous>, transform_indices = @transform_2, window_bounds = array<i64: 1, 32>}, {pipeline_mode = #tpu.pipeline_mode<synchronous>, transform_indices = @transform_3, window_bounds = array<i64: 32, 96>}, {pipeline_mode = #tpu.pipeline_mode<synchronous>, transform_indices = @transform_4, window_bounds = array<i64: 1, 96>}, {transform_indices = @transform_5, window_bounds = array<i64: 1, 4, 64, 8>}, {transform_indices = @transform_6, window_bounds = array<i64: 1, 4, 64, 8>}, {transform_indices = @transform_7, window_bounds = array<i64: 1, 4, 64, 8>}]} {
    %c0 = arith.constant 0 : index
    %c0_0 = arith.constant 0 : index
    %c0_1 = arith.constant 0 : index
    %0 = vector.load %arg2[%c0, %c0_0, %c0_1] : memref<1x64x32xf32, #tpu.memory_space<vmem>>, vector<1x64x32xf32>
    %1 = vector.shape_cast %0 : vector<1x64x32xf32> to vector<64x32xf32>
    %c0_2 = arith.constant 0 : index
    %c0_3 = arith.constant 0 : index
    %2 = vector.load %arg3[%c0_2, %c0_3] : memref<1x32xf32, #tpu.memory_space<vmem>>, vector<1x32xf32>
    %3 = vector.shape_cast %2 : vector<1x32xf32> to vector<32xf32>
    %c0_4 = arith.constant 0 : index
    %c0_5 = arith.constant 0 : index
    %4 = vector.load %arg4[%c0_4, %c0_5] : memref<1x32xf32, #tpu.memory_space<vmem>>, vector<1x32xf32>
    %5 = vector.shape_cast %4 : vector<1x32xf32> to vector<32xf32>
    %cst = arith.constant dense<0.000000e+00> : vector<64xf32>
    %6 = vector.multi_reduction <add>, %1, %cst [1] : vector<64x32xf32> to vector<64xf32>
    %7 = vector.shape_cast %6 : vector<64xf32> to vector<64x1xf32>
    %cst_6 = arith.constant 3.200000e+01 : f32
    %8 = vector.broadcast %cst_6 : f32 to vector<64x1xf32>
    %9 = arith.divf %7, %8 : vector<64x1xf32>
    %10 = vector.broadcast %9 : vector<64x1xf32> to vector<64x32xf32>
    %11 = arith.subf %1, %10 : vector<64x32xf32>
    %12 = arith.mulf %11, %11 : vector<64x32xf32>
    %cst_7 = arith.constant dense<0.000000e+00> : vector<64xf32>
    %13 = vector.multi_reduction <add>, %12, %cst_7 [1] : vector<64x32xf32> to vector<64xf32>
    %14 = vector.shape_cast %13 : vector<64xf32> to vector<64x1xf32>
    %cst_8 = arith.constant 3.200000e+01 : f32
    %15 = vector.broadcast %cst_8 : f32 to vector<64x1xf32>
    %16 = arith.divf %14, %15 : vector<64x1xf32>
    %17 = vector.broadcast %9 : vector<64x1xf32> to vector<64x32xf32>
    %18 = arith.subf %1, %17 : vector<64x32xf32>
    %cst_9 = arith.constant 9.99999974E-6 : f32
    %19 = vector.broadcast %cst_9 : f32 to vector<64x1xf32>
    %20 = arith.addf %16, %19 : vector<64x1xf32>
    %21 = math.rsqrt %20 : vector<64x1xf32>
    %22 = vector.broadcast %21 : vector<64x1xf32> to vector<64x32xf32>
    %23 = arith.mulf %18, %22 : vector<64x32xf32>
    %24 = vector.shape_cast %3 : vector<32xf32> to vector<1x32xf32>
    %25 = vector.broadcast %24 : vector<1x32xf32> to vector<64x32xf32>
    %26 = arith.mulf %23, %25 : vector<64x32xf32>
    %27 = vector.shape_cast %5 : vector<32xf32> to vector<1x32xf32>
    %28 = vector.broadcast %27 : vector<1x32xf32> to vector<64x32xf32>
    %29 = arith.addf %26, %28 : vector<64x32xf32>
    %30 = arith.truncf %29 : vector<64x32xf32> to vector<64x32xbf16>
    %c0_10 = arith.constant 0 : index
    %c0_11 = arith.constant 0 : index
    %31 = vector.load %arg5[%c0_10, %c0_11] : memref<32x96xbf16, #tpu.memory_space<vmem>>, vector<32x96xbf16>
    %cst_12 = arith.constant dense<0.000000e+00> : vector<64x96xf32>
    %32 = tpu.matmul %30, %31, %cst_12 {dimension_numbers = #tpu.dot_dimension_numbers<[1], [0], [0], [1], [0, 0, 1, 1], [], []>} : vector<64x32xbf16>, vector<32x96xbf16>, vector<64x96xf32> -> vector<64x96xf32>
    %c0_13 = arith.constant 0 : index
    %c0_14 = arith.constant 0 : index
    %33 = vector.load %arg6[%c0_13, %c0_14] : memref<1x96xf32, #tpu.memory_space<vmem>>, vector<1x96xf32>
    %34 = vector.shape_cast %33 : vector<1x96xf32> to vector<96xf32>
    %35 = vector.shape_cast %34 : vector<96xf32> to vector<1x96xf32>
    %36 = vector.broadcast %35 : vector<1x96xf32> to vector<64x96xf32>
    %37 = arith.addf %32, %36 : vector<64x96xf32>
    %38 = vector.extract_strided_slice %37 {offsets = [0, 0], sizes = [64, 8], strides = [1, 1]} : vector<64x96xf32> to vector<64x8xf32>
    %cst_15 = arith.constant 0.353553385 : f32
    %39 = vector.broadcast %cst_15 : f32 to vector<64x8xf32>
    %40 = arith.mulf %38, %39 : vector<64x8xf32>
    %41 = arith.truncf %40 : vector<64x8xf32> to vector<64x8xbf16>
    %c0_16 = arith.constant 0 : index
    %c0_17 = arith.constant 0 : index
    %c0_18 = arith.constant 0 : index
    %c0_19 = arith.constant 0 : index
    %42 = vector.load %arg7[%c0_16, %c0_17, %c0_18, %c0_19] : memref<1x4x64x8xbf16, #tpu.memory_space<vmem>>, vector<1x1x64x8xbf16>
    %43 = vector.shape_cast %42 : vector<1x1x64x8xbf16> to vector<64x8xbf16>
    %44 = vector.shape_cast %41 : vector<64x8xbf16> to vector<1x1x64x8xbf16>
    tpu.vector_store %arg7[%c0_16, %c0_17, %c0_18, %c0_19], %44 {strides = array<i32>} : memref<1x4x64x8xbf16, #tpu.memory_space<vmem>>, vector<1x1x64x8xbf16>,
    %45 = vector.extract_strided_slice %37 {offsets = [0, 32], sizes = [64, 8], strides = [1, 1]} : vector<64x96xf32> to vector<64x8xf32>
    %46 = arith.truncf %45 : vector<64x8xf32> to vector<64x8xbf16>
    %c0_20 = arith.constant 0 : index
    %c0_21 = arith.constant 0 : index
    %c0_22 = arith.constant 0 : index
    %c0_23 = arith.constant 0 : index
    %47 = vector.load %arg8[%c0_20, %c0_21, %c0_22, %c0_23] : memref<1x4x64x8xbf16, #tpu.memory_space<vmem>>, vector<1x1x64x8xbf16>
    %48 = vector.shape_cast %47 : vector<1x1x64x8xbf16> to vector<64x8xbf16>
    %49 = vector.shape_cast %46 : vector<64x8xbf16> to vector<1x1x64x8xbf16>
    tpu.vector_store %arg8[%c0_20, %c0_21, %c0_22, %c0_23], %49 {strides = array<i32>} : memref<1x4x64x8xbf16, #tpu.memory_space<vmem>>, vector<1x1x64x8xbf16>,
    %50 = vector.extract_strided_slice %37 {offsets = [0, 64], sizes = [64, 8], strides = [1, 1]} : vector<64x96xf32> to vector<64x8xf32>
    %51 = arith.truncf %50 : vector<64x8xf32> to vector<64x8xbf16>
    %c0_24 = arith.constant 0 : index
    %c0_25 = arith.constant 0 : index
    %c0_26 = arith.constant 0 : index
    %c0_27 = arith.constant 0 : index
    %52 = vector.load %arg9[%c0_24, %c0_25, %c0_26, %c0_27] : memref<1x4x64x8xbf16, #tpu.memory_space<vmem>>, vector<1x1x64x8xbf16>
    %53 = vector.shape_cast %52 : vector<1x1x64x8xbf16> to vector<64x8xbf16>
    %54 = vector.shape_cast %51 : vector<64x8xbf16> to vector<1x1x64x8xbf16>
    tpu.vector_store %arg9[%c0_24, %c0_25, %c0_26, %c0_27], %54 {strides = array<i32>} : memref<1x4x64x8xbf16, #tpu.memory_space<vmem>>, vector<1x1x64x8xbf16>,
    %55 = vector.extract_strided_slice %37 {offsets = [0, 8], sizes = [64, 8], strides = [1, 1]} : vector<64x96xf32> to vector<64x8xf32>
    %cst_28 = arith.constant 0.353553385 : f32
    %56 = vector.broadcast %cst_28 : f32 to vector<64x8xf32>
    %57 = arith.mulf %55, %56 : vector<64x8xf32>
    %58 = arith.truncf %57 : vector<64x8xf32> to vector<64x8xbf16>
    %c0_29 = arith.constant 0 : index
    %c1 = arith.constant 1 : index
    %c0_30 = arith.constant 0 : index
    %c0_31 = arith.constant 0 : index
    %59 = vector.load %arg7[%c0_29, %c1, %c0_30, %c0_31] : memref<1x4x64x8xbf16, #tpu.memory_space<vmem>>, vector<1x1x64x8xbf16>
    %60 = vector.shape_cast %59 : vector<1x1x64x8xbf16> to vector<64x8xbf16>
    %61 = vector.shape_cast %58 : vector<64x8xbf16> to vector<1x1x64x8xbf16>
    tpu.vector_store %arg7[%c0_29, %c1, %c0_30, %c0_31], %61 {strides = array<i32>} : memref<1x4x64x8xbf16, #tpu.memory_space<vmem>>, vector<1x1x64x8xbf16>,
    %62 = vector.extract_strided_slice %37 {offsets = [0, 40], sizes = [64, 8], strides = [1, 1]} : vector<64x96xf32> to vector<64x8xf32>
    %63 = arith.truncf %62 : vector<64x8xf32> to vector<64x8xbf16>
    %c0_32 = arith.constant 0 : index
    %c1_33 = arith.constant 1 : index
    %c0_34 = arith.constant 0 : index
    %c0_35 = arith.constant 0 : index
    %64 = vector.load %arg8[%c0_32, %c1_33, %c0_34, %c0_35] : memref<1x4x64x8xbf16, #tpu.memory_space<vmem>>, vector<1x1x64x8xbf16>
    %65 = vector.shape_cast %64 : vector<1x1x64x8xbf16> to vector<64x8xbf16>
    %66 = vector.shape_cast %63 : vector<64x8xbf16> to vector<1x1x64x8xbf16>
    tpu.vector_store %arg8[%c0_32, %c1_33, %c0_34, %c0_35], %66 {strides = array<i32>} : memref<1x4x64x8xbf16, #tpu.memory_space<vmem>>, vector<1x1x64x8xbf16>,
    %67 = vector.extract_strided_slice %37 {offsets = [0, 72], sizes = [64, 8], strides = [1, 1]} : vector<64x96xf32> to vector<64x8xf32>
    %68 = arith.truncf %67 : vector<64x8xf32> to vector<64x8xbf16>
    %c0_36 = arith.constant 0 : index
    %c1_37 = arith.constant 1 : index
    %c0_38 = arith.constant 0 : index
    %c0_39 = arith.constant 0 : index
    %69 = vector.load %arg9[%c0_36, %c1_37, %c0_38, %c0_39] : memref<1x4x64x8xbf16, #tpu.memory_space<vmem>>, vector<1x1x64x8xbf16>
    %70 = vector.shape_cast %69 : vector<1x1x64x8xbf16> to vector<64x8xbf16>
    %71 = vector.shape_cast %68 : vector<64x8xbf16> to vector<1x1x64x8xbf16>
    tpu.vector_store %arg9[%c0_36, %c1_37, %c0_38, %c0_39], %71 {strides = array<i32>} : memref<1x4x64x8xbf16, #tpu.memory_space<vmem>>, vector<1x1x64x8xbf16>,
    %72 = vector.extract_strided_slice %37 {offsets = [0, 16], sizes = [64, 8], strides = [1, 1]} : vector<64x96xf32> to vector<64x8xf32>
    %cst_40 = arith.constant 0.353553385 : f32
    %73 = vector.broadcast %cst_40 : f32 to vector<64x8xf32>
    %74 = arith.mulf %72, %73 : vector<64x8xf32>
    %75 = arith.truncf %74 : vector<64x8xf32> to vector<64x8xbf16>
    %c0_41 = arith.constant 0 : index
    %c2 = arith.constant 2 : index
    %c0_42 = arith.constant 0 : index
    %c0_43 = arith.constant 0 : index
    %76 = vector.load %arg7[%c0_41, %c2, %c0_42, %c0_43] : memref<1x4x64x8xbf16, #tpu.memory_space<vmem>>, vector<1x1x64x8xbf16>
    %77 = vector.shape_cast %76 : vector<1x1x64x8xbf16> to vector<64x8xbf16>
    %78 = vector.shape_cast %75 : vector<64x8xbf16> to vector<1x1x64x8xbf16>
    tpu.vector_store %arg7[%c0_41, %c2, %c0_42, %c0_43], %78 {strides = array<i32>} : memref<1x4x64x8xbf16, #tpu.memory_space<vmem>>, vector<1x1x64x8xbf16>,
    %79 = vector.extract_strided_slice %37 {offsets = [0, 48], sizes = [64, 8], strides = [1, 1]} : vector<64x96xf32> to vector<64x8xf32>
    %80 = arith.truncf %79 : vector<64x8xf32> to vector<64x8xbf16>
    %c0_44 = arith.constant 0 : index
    %c2_45 = arith.constant 2 : index
    %c0_46 = arith.constant 0 : index
    %c0_47 = arith.constant 0 : index
    %81 = vector.load %arg8[%c0_44, %c2_45, %c0_46, %c0_47] : memref<1x4x64x8xbf16, #tpu.memory_space<vmem>>, vector<1x1x64x8xbf16>
    %82 = vector.shape_cast %81 : vector<1x1x64x8xbf16> to vector<64x8xbf16>
    %83 = vector.shape_cast %80 : vector<64x8xbf16> to vector<1x1x64x8xbf16>
    tpu.vector_store %arg8[%c0_44, %c2_45, %c0_46, %c0_47], %83 {strides = array<i32>} : memref<1x4x64x8xbf16, #tpu.memory_space<vmem>>, vector<1x1x64x8xbf16>,
    %84 = vector.extract_strided_slice %37 {offsets = [0, 80], sizes = [64, 8], strides = [1, 1]} : vector<64x96xf32> to vector<64x8xf32>
    %85 = arith.truncf %84 : vector<64x8xf32> to vector<64x8xbf16>
    %c0_48 = arith.constant 0 : index
    %c2_49 = arith.constant 2 : index
    %c0_50 = arith.constant 0 : index
    %c0_51 = arith.constant 0 : index
    %86 = vector.load %arg9[%c0_48, %c2_49, %c0_50, %c0_51] : memref<1x4x64x8xbf16, #tpu.memory_space<vmem>>, vector<1x1x64x8xbf16>
    %87 = vector.shape_cast %86 : vector<1x1x64x8xbf16> to vector<64x8xbf16>
    %88 = vector.shape_cast %85 : vector<64x8xbf16> to vector<1x1x64x8xbf16>
    tpu.vector_store %arg9[%c0_48, %c2_49, %c0_50, %c0_51], %88 {strides = array<i32>} : memref<1x4x64x8xbf16, #tpu.memory_space<vmem>>, vector<1x1x64x8xbf16>,
    %89 = vector.extract_strided_slice %37 {offsets = [0, 24], sizes = [64, 8], strides = [1, 1]} : vector<64x96xf32> to vector<64x8xf32>
    %cst_52 = arith.constant 0.353553385 : f32
    %90 = vector.broadcast %cst_52 : f32 to vector<64x8xf32>
    %91 = arith.mulf %89, %90 : vector<64x8xf32>
    %92 = arith.truncf %91 : vector<64x8xf32> to vector<64x8xbf16>
    %c0_53 = arith.constant 0 : index
    %c3 = arith.constant 3 : index
    %c0_54 = arith.constant 0 : index
    %c0_55 = arith.constant 0 : index
    %93 = vector.load %arg7[%c0_53, %c3, %c0_54, %c0_55] : memref<1x4x64x8xbf16, #tpu.memory_space<vmem>>, vector<1x1x64x8xbf16>
    %94 = vector.shape_cast %93 : vector<1x1x64x8xbf16> to vector<64x8xbf16>
    %95 = vector.shape_cast %92 : vector<64x8xbf16> to vector<1x1x64x8xbf16>
    tpu.vector_store %arg7[%c0_53, %c3, %c0_54, %c0_55], %95 {strides = array<i32>} : memref<1x4x64x8xbf16, #tpu.memory_space<vmem>>, vector<1x1x64x8xbf16>,
    %96 = vector.extract_strided_slice %37 {offsets = [0, 56], sizes = [64, 8], strides = [1, 1]} : vector<64x96xf32> to vector<64x8xf32>
    %97 = arith.truncf %96 : vector<64x8xf32> to vector<64x8xbf16>
    %c0_56 = arith.constant 0 : index
    %c3_57 = arith.constant 3 : index
    %c0_58 = arith.constant 0 : index
    %c0_59 = arith.constant 0 : index
    %98 = vector.load %arg8[%c0_56, %c3_57, %c0_58, %c0_59] : memref<1x4x64x8xbf16, #tpu.memory_space<vmem>>, vector<1x1x64x8xbf16>
    %99 = vector.shape_cast %98 : vector<1x1x64x8xbf16> to vector<64x8xbf16>
    %100 = vector.shape_cast %97 : vector<64x8xbf16> to vector<1x1x64x8xbf16>
    tpu.vector_store %arg8[%c0_56, %c3_57, %c0_58, %c0_59], %100 {strides = array<i32>} : memref<1x4x64x8xbf16, #tpu.memory_space<vmem>>, vector<1x1x64x8xbf16>,
    %101 = vector.extract_strided_slice %37 {offsets = [0, 88], sizes = [64, 8], strides = [1, 1]} : vector<64x96xf32> to vector<64x8xf32>
    %102 = arith.truncf %101 : vector<64x8xf32> to vector<64x8xbf16>
    %c0_60 = arith.constant 0 : index
    %c3_61 = arith.constant 3 : index
    %c0_62 = arith.constant 0 : index
    %c0_63 = arith.constant 0 : index
    %103 = vector.load %arg9[%c0_60, %c3_61, %c0_62, %c0_63] : memref<1x4x64x8xbf16, #tpu.memory_space<vmem>>, vector<1x1x64x8xbf16>
    %104 = vector.shape_cast %103 : vector<1x1x64x8xbf16> to vector<64x8xbf16>
    %105 = vector.shape_cast %102 : vector<64x8xbf16> to vector<1x1x64x8xbf16>
    tpu.vector_store %arg9[%c0_60, %c3_61, %c0_62, %c0_63], %105 {strides = array<i32>} : memref<1x4x64x8xbf16, #tpu.memory_space<vmem>>, vector<1x1x64x8xbf16>,
    return
  }
  func.func @transform_0(%arg0: i32, %arg1: i32) -> (i32, i32, i32) {
    %c0_i32 = arith.constant 0 : i32
    %c0_i32_0 = arith.constant 0 : i32
    return %arg0, %arg1, %c0_i32 : i32, i32, i32
  }
  func.func @transform_1(%arg0: i32, %arg1: i32) -> (i32, i32) {
    %c0_i32 = arith.constant 0 : i32
    %c0_i32_0 = arith.constant 0 : i32
    %c0_i32_1 = arith.constant 0 : i32
    return %c0_i32, %c0_i32_0 : i32, i32
  }
  func.func @transform_2(%arg0: i32, %arg1: i32) -> (i32, i32) {
    %c0_i32 = arith.constant 0 : i32
    %c0_i32_0 = arith.constant 0 : i32
    %c0_i32_1 = arith.constant 0 : i32
    return %c0_i32, %c0_i32_0 : i32, i32
  }
  func.func @transform_3(%arg0: i32, %arg1: i32) -> (i32, i32) {
    %c0_i32 = arith.constant 0 : i32
    %c0_i32_0 = arith.constant 0 : i32
    %c0_i32_1 = arith.constant 0 : i32
    return %c0_i32, %c0_i32_0 : i32, i32
  }
  func.func @transform_4(%arg0: i32, %arg1: i32) -> (i32, i32) {
    %c0_i32 = arith.constant 0 : i32
    %c0_i32_0 = arith.constant 0 : i32
    %c0_i32_1 = arith.constant 0 : i32
    return %c0_i32, %c0_i32_0 : i32, i32
  }
  func.func @transform_5(%arg0: i32, %arg1: i32) -> (i32, i32, i32, i32) {
    %c0_i32 = arith.constant 0 : i32
    %c0_i32_0 = arith.constant 0 : i32
    %c0_i32_1 = arith.constant 0 : i32
    return %arg0, %c0_i32, %arg1, %c0_i32_0 : i32, i32, i32, i32
  }
  func.func @transform_6(%arg0: i32, %arg1: i32) -> (i32, i32, i32, i32) {
    %c0_i32 = arith.constant 0 : i32
    %c0_i32_0 = arith.constant 0 : i32
    %c0_i32_1 = arith.constant 0 : i32
    return %arg0, %c0_i32, %arg1, %c0_i32_0 : i32, i32, i32, i32
  }
  func.func @transform_7(%arg0: i32, %arg1: i32) -> (i32, i32, i32, i32) {
    %c0_i32 = arith.constant 0 : i32
    %c0_i32_0 = arith.constant 0 : i32
    %c0_i32_1 = arith.constant 0 : i32
    return %arg0, %c0_i32, %arg1, %c0_i32_0 : i32, i32, i32, i32
  }
}

</mosaic_0001>

<bundles_post_ra>
// kernel: tpu_custom_call.1
= control target key start
LH: loop header
LB: loop body
LE: loop exit
PB: predicated region body
PF: predicated region fallthrough
CT: control target
= control target key end

     0   :  { %s2016_s24 = smov 0   ;;  %s2018_s25 = smov 0   ;;  %s2642_s0 = inlined_call_operand.vmem [shape: f32[2,128,32], index: 0, kind: input, shape index: {}]   ;;  %s2643_s1 = inlined_call_operand.vmem [shape: f32[1,32], index: 1, kind: input, shape index: {}]   ;;  %s2644_s2 = inlined_call_operand.vmem [shape: f32[1,32], index: 2, kind: input, shape index: {}]   ;;  %s2645_s3 = inlined_call_operand.vmem [shape: bf16[32,96], index: 3, kind: input, shape index: {}]   ;;  %s2646_s4 = inlined_call_operand.vmem [shape: f32[1,96], index: 4, kind: input, shape index: {}]   ;;  %s2647_s5 = inlined_call_operand.vmem [shape: bf16[2,4,128,8], index: 5, kind: output, shape index: {0}]   ;;  %s2648_s6 = inlined_call_operand.vmem [shape: bf16[2,4,128,8], index: 6, kind: output, shape index: {1}]   ;;  %s2649_s7 = inlined_call_operand.vmem [shape: bf16[2,4,128,8], index: 7, kind: output, shape index: {2}]  }
   0x1   :  { %s2020_s26 = smov 0   ;;  %s2022_s27 = smov 0  }
   0x2   :  { %s2024_s28 = smov 0   ;;  %s2026_s29 = smov 0  }
   0x3   :  { %s2028_s30 = smov 0  }
   0x4 LB: > { %s27_s8 = sadd.s32 1, %s1955_s28  ;;  %s30_s9 = sadd.s32 1, %s1959_s29  ;;  %s1963_s30 = sphi %s2028_s30, %s18_s30   ;;  %s1959_s29 = sphi %s2026_s29, %s2656_s29   ;;  %s1955_s28 = sphi %s2024_s28, %s2655_s28   ;;  %s1951_s27 = sphi %s2022_s27, %s2654_s27   ;;  %s1947_s26 = sphi %s2020_s26, %s2653_s26   ;;  %s1943_s25 = sphi %s2018_s25, %s2652_s25   ;;  %s1939_s24 = sphi %s2016_s24, %s2651_s24  }
   0x5   : > { %p28_p0 = scmp.ge.s32.totalorder %s27_s8, 2  ;;  %s1664_s10 = sadd.s32 4294967295, %s1963_s30  }
   0x6   : > { %p161_p1 = scmp.ne.s32.totalorder %s1943_s25, %s1939_s24  ;;  %p162_p2 = scmp.eq.s32.totalorder %s1664_s10, 3 }
   0x7   : > { %s2658_s8 = smov (%p28_p0, %s27_s8), 0  ;;  %s2660_s9 = smov (!%p28_p0, %s30_s9), %s1959_s29 }
   0x8   : > { %s147_s11 = ssub.s32 %s1955_s28, %s2658_s8  ;;  %p32_p3 = scmp.ge.s32.totalorder %s2660_s9, 2 }
   0x9   : > { %p1668_p4 = scmp.ge.s32.totalorder %s1963_s30, 1  ;;  %p2060_p5 = por %p162_p2, %p161_p1 }
   0xa   : > { %p267_p6 = scmp.lt.s32.totalorder %s1963_s30, 5  ;;  %s2662_s9 = smov (%p32_p3, %s2660_s9), 0 }
   0xb   : > { %s146_s13 = ssub.s32 %s1959_s29, %s2662_s9  ;;  %s151_s15 = sadd.s32 1, %s1943_s25 }
   0xc   : > { %p268_p7 = pnand %p1668_p4, %p267_p6  ;;  %s148_s14 = sor.u32 %s147_s11, %s146_s13 }
   0xd   : > { %p149_p8 = scmp.eq.s32.totalorder %s148_s14, 0  ;;  %s2073_s17 = sshll.u32 (!%p268_p7), %s1947_s26, 3  ;;  %vm334_vm0 = vcmask (!%p268_p7), 261120   ;;  %v1891_v56 = vld [vmem:[%s2645_s3] sm:$0xff] (!%p268_p7)   ;;  %v1892_v57 = vld [vmem:[%s2645_s3 + $0x8] sm:$0xff] (!%p268_p7)   ;;  %vm612_vm1 = vcmask (!%p268_p7), 60416  }
   0xe   : > { %271 = sbr.rel (%p268_p7) target bundleno = 891 (0x37b), region = 40  ;;  %p311_p9 = scmp.lt.s32.totalorder (!%p268_p7), %s1951_s27, 1  ;;  %1808 = vmatprep.subr.bf16.mxu0 (!%p268_p7), %v1891_v56  ;;  %1820 = vmatprep.subr.bf16.mxu1 (!%p268_p7), %v1891_v56 }
   0xf   : > { %s2071_s16 = scalar_select %p149_p8, %s1943_s25, %s151_s15  }
  0x10   : > { %p313_p10 = scmp.lt.s32.totalorder (!%p268_p7), %s2073_s17, 15  ;;  %1809 = vmatpush3.bf16.msra.mxu0 (!%p268_p7), %v1891_v56  ;;  %1822 = vmatpush3.bf16.msra.mxu1 (!%p268_p7), %v1891_v56  ;;  %s1966_s13 = smov (!%p268_p7), 64  }
  0x11   : > { %1810 = vmatprep.subr.bf16.mxu0 (!%p268_p7), %v1892_v57  ;;  %1821 = vmatprep.subr.bf16.mxu1 (!%p268_p7), %v1892_v57  ;;  %s1967_s14 = smov (!%p268_p7), 88   ;;  %s1968_s15 = smov (!%p268_p7), 56  }
  0x12   : > { %s1973_s10 = smov (!%p268_p7), 120  }
  0x14   : > { %1811 = vmatpush3.bf16.msra.mxu0 (!%p268_p7), %v1892_v57  ;;  %1823 = vmatpush3.bf16.msra.mxu1 (!%p268_p7), %v1892_v57 }
  0x15   : > { %s312_s18 = scalar_select %p311_p9, %s1951_s27, 1 }
  0x16   : > { %s314_s19 = scalar_select %p313_p10, %s2073_s17, 15 }
  0x17   : > { %s1673_s20 = sshll.u32 %s312_s18, 4  ;;  %s1969_s18 = smov 80  }
  0x18   : > { %s316_s21 = sadd.s32 %s1673_s20, %s314_s19  ;;  %s1970_s19 = smov 48  }
  0x19   : > { %s1674_s22 = sshll.u32 %s316_s21, 3  ;;  %s1971_s20 = smov 72  }
  0x1a   : > { %s318_s11 = scalar_lea.vmem %s2642_s0, %s1674_s22  ;;  %s295_s22 = sand.u32 1, %s1939_s24  }
  0x1b   : > { %v324_v0 = vld [vmem:[%s318_s11] sm:$0xff]  ;;  %v325_v2 = vld [vmem:[%s318_s11 + $0x8] sm:$0xff]  ;;  %v326_v8 = vld [vmem:[%s318_s11 + $0x10] sm:$0xff]  ;;  %s1965_s24 = smov 96   ;;  %s1972_s21 = smov 40  }
  0x1c   : > { %v328_v1 = vld [vmem:[%s318_s11 + $0x20] sm:$0xff]  ;;  %v335_v3 = vsel %vm334_vm0, %v324_v0, 0.0  ;;  %v329_v5 = vld [vmem:[%s318_s11 + $0x28] sm:$0xff]  ;;  %v338_v6 = vsel %vm334_vm0, %v325_v2, 0.0  ;;  %v327_v9 = vld [vmem:[%s318_s11 + $0x18] sm:$0xff]  ;;  %v341_v10 = vsel %vm334_vm0, %v326_v8, 0.0 }
  0x1d   : > { %v347_v4 = vsel %vm334_vm0, %v328_v1, 0.0  ;;  %336 = vadd.xlane.f32.xlu0 %v335_v3  ;;  %v350_v7 = vsel %vm334_vm0, %v329_v5, 0.0  ;;  %v344_v11 = vsel %vm334_vm0, %v327_v9, 0.0  ;;  %v330_v12 = vld [vmem:[%s318_s11 + $0x30] sm:$0xff]  ;;  %v331_v13 = vld [vmem:[%s318_s11 + $0x38] sm:$0xff]  ;;  %s2158_s11 = sshll.u32 %s295_s22, 7 }
  0x1e   : > { %348 = vadd.xlane.f32.xlu1 %v347_v4  ;;  %v353_v14 = vsel %vm334_vm0, %v330_v12, 0.0  ;;  %v356_v15 = vsel %vm334_vm0, %v331_v13, 0.0  ;;  %s2179_s26 = scalar_lea.vmem [#allocation2], %s2158_s11  ;;  %s2314_s22 = scalar_lea.vmem [#allocation3], %s2158_s11 }
  0x1f   : > { %s2327_s23 = scalar_lea.vmem [#allocation4], %s2158_s11  ;;  %s1974_s11 = smov 112  }
  0x21   : > { %339 = vadd.xlane.f32.xlu0 %v338_v6 }
  0x22   : > { %351 = vadd.xlane.f32.xlu1 %v350_v7 }
  0x25   : > { %342 = vadd.xlane.f32.xlu0 %v341_v10 }
  0x26   : > { %345 = vadd.xlane.f32.xlu1 %v344_v11 }
  0x29   : > { %354 = vadd.xlane.f32.xlu0 %v353_v14 }
  0x2a   : > { %357 = vadd.xlane.f32.xlu1 %v356_v15 }
  0xaa   : > { %v337_v16 = vpop.xlane.xlu0 %336 }
  0xab   : > { %v349_v17 = vpop.xlane.xlu1 %348  ;;  %v360_v18 = vmul.f32 0.03125, %v337_v16 }
  0xac   : > { %v364_v19 = vmul.f32 0.03125, %v349_v17 }
  0xad   : > { %v2090_v20 = vsub.f32 %v324_v0, %v360_v18 }
  0xae   : > { %v2092_v21 = vsub.f32 %v328_v1, %v364_v19  ;;  %v340_v22 = vpop.xlane.xlu0 %339  ;;  %v1675_v19 = vld [vmem:[%s2643_s1] ss:$0 sm:$0xff] }
  0xaf   : > { %v352_v23 = vpop.xlane.xlu1 %351  ;;  %v361_v24 = vmul.f32 0.03125, %v340_v22  ;;  %v376_v26 = vmul.f32 %v2090_v20, %v2090_v20 }
  0xb0   : > { %v365_v25 = vmul.f32 0.03125, %v352_v23  ;;  %v380_v27 = vmul.f32 %v2092_v21, %v2092_v21 }
  0xb1   : > { %v2098_v28 = vsub.f32 %v325_v2, %v361_v24  ;;  %v384_v30 = vsel %vm334_vm0, %v376_v26, 0.0 }
  0xb2   : > { %v2100_v29 = vsub.f32 %v329_v5, %v365_v25  ;;  %385 = vadd.xlane.f32.xlu0 %v384_v30  ;;  %v343_v31 = vpop.xlane.xlu0 %342  ;;  %v396_v33 = vsel %vm334_vm0, %v380_v27, 0.0  ;;  %v1676_v27 = vld [vmem:[%s2644_s2] ss:$0 sm:$0xff] }
  0xb3   : > { %v346_v32 = vpop.xlane.xlu1 %345  ;;  %v362_v34 = vmul.f32 0.03125, %v343_v31  ;;  %v377_v36 = vmul.f32 %v2098_v28, %v2098_v28 }
  0xb4   : > { %v363_v35 = vmul.f32 0.03125, %v346_v32  ;;  %v381_v37 = vmul.f32 %v2100_v29, %v2100_v29 }
  0xb5   : > { %v2108_v38 = vsub.f32 %v326_v8, %v362_v34  ;;  %v387_v40 = vsel %vm334_vm0, %v377_v36, 0.0 }
  0xb6   : > { %v2110_v39 = vsub.f32 %v327_v9, %v363_v35  ;;  %397 = vadd.xlane.f32.xlu0 %v396_v33  ;;  %388 = vadd.xlane.f32.xlu1 %v387_v40  ;;  %v355_v41 = vpop.xlane.xlu0 %354  ;;  %v399_v43 = vsel %vm334_vm0, %v381_v37, 0.0 }
  0xb7   : > { %v358_v42 = vpop.xlane.xlu1 %357  ;;  %v366_v44 = vmul.f32 0.03125, %v355_v41  ;;  %v378_v46 = vmul.f32 %v2108_v38, %v2108_v38 }
  0xb8   : > { %v367_v45 = vmul.f32 0.03125, %v358_v42  ;;  %v379_v47 = vmul.f32 %v2110_v39, %v2110_v39 }
  0xb9   : > { %v2118_v48 = vsub.f32 %v330_v12, %v366_v44  ;;  %v390_v50 = vsel %vm334_vm0, %v378_v46, 0.0 }
  0xba   : > { %v2120_v49 = vsub.f32 %v331_v13, %v367_v45  ;;  %400 = vadd.xlane.f32.xlu1 %v399_v43  ;;  %391 = vadd.xlane.f32.xlu0 %v390_v50  ;;  %v393_v51 = vsel %vm334_vm0, %v379_v47, 0.0 }
  0xbb   : > { %v382_v52 = vmul.f32 %v2118_v48, %v2118_v48 }
  0xbc   : > { %v383_v53 = vmul.f32 %v2120_v49, %v2120_v49 }
  0xbd   : > { %v402_v54 = vsel %vm334_vm0, %v382_v52, 0.0 }
  0xbe   : > { %394 = vadd.xlane.f32.xlu1 %v393_v51  ;;  %403 = vadd.xlane.f32.xlu0 %v402_v54  ;;  %v405_v55 = vsel %vm334_vm0, %v383_v53, 0.0 }
  0xc2   : > { %406 = vadd.xlane.f32.xlu1 %v405_v55 }
 0x13f   : > { %v386_v58 = vpop.xlane.xlu0 %385 }
 0x140   : > { %v408_v59 = vmul.f32 0.03125, %v386_v58 }
 0x142   : > { %v416_v60 = vadd.f32 1e-05, %v408_v59 }
 0x143   : > { %v389_v61 = vpop.xlane.xlu1 %388  ;;  %v398_v62 = vpop.xlane.xlu0 %397 }
 0x144   : > { %1893 = vrsqrt.f32 %v416_v60  ;;  %v409_v63 = vmul.f32 0.03125, %v389_v61  ;;  %v412_v0 = vmul.f32 0.03125, %v398_v62 }
 0x146   : > { %v417_v1 = vadd.f32 1e-05, %v409_v63  ;;  %v420_v2 = vadd.f32 1e-05, %v412_v0 }
 0x147   : > { %v401_v3 = vpop.xlane.xlu1 %400  ;;  %v392_v4 = vpop.xlane.xlu0 %391 }
 0x148   : > { %1895 = vrsqrt.f32 %v417_v1  ;;  %v413_v5 = vmul.f32 0.03125, %v401_v3  ;;  %v410_v6 = vmul.f32 0.03125, %v392_v4 }
 0x149   : > { %1897 = vrsqrt.f32 %v420_v2 }
 0x14a   : > { %v421_v7 = vadd.f32 1e-05, %v413_v5  ;;  %v418_v8 = vadd.f32 1e-05, %v410_v6 }
 0x14b   : > { %v395_v9 = vpop.xlane.xlu1 %394  ;;  %v404_v10 = vpop.xlane.xlu0 %403 }
 0x14c   : > { %1899 = vrsqrt.f32 %v421_v7  ;;  %v411_v11 = vmul.f32 0.03125, %v395_v9  ;;  %v414_v12 = vmul.f32 0.03125, %v404_v10 }
 0x14d   : > { %1901 = vrsqrt.f32 %v418_v8 }
 0x14e   : > { %v1894_v13 = vpop.eup %1893  ;;  %v419_v14 = vadd.f32 1e-05, %v411_v11  ;;  %v422_v15 = vadd.f32 1e-05, %v414_v12 }
 0x14f   : > { %v407_v16 = vpop.xlane.xlu1 %406  ;;  %v432_v17 = vmul.f32 %v1894_v13, %v2090_v20 }
 0x150   : > { %1903 = vrsqrt.f32 %v419_v14  ;;  %v415_v18 = vmul.f32 0.03125, %v407_v16 }
 0x151   : > { %1905 = vrsqrt.f32 %v422_v15  ;;  %v446_v26 = vmul.f32 %v1675_v19, %v432_v17 }
 0x152   : > { %v1896_v22 = vpop.eup %1895  ;;  %v423_v23 = vadd.f32 1e-05, %v415_v18 }
 0x153   : > { %v1898_v24 = vpop.eup %1897  ;;  %v433_v25 = vmul.f32 %v1896_v22, %v2098_v28  ;;  %v460_v33 = vadd.f32 %v1676_v27, %v446_v26 }
 0x154   : > { %1907 = vrsqrt.f32 %v423_v23  ;;  %v436_v20 = vmul.f32 %v1898_v24, %v2092_v21 }
 0x155   : > { %v447_v30 = vmul.f32 %v1675_v19, %v433_v25 }
 0x156   : > { %v1900_v31 = vpop.eup %1899  ;;  %v450_v36 = vmul.f32 %v1675_v19, %v436_v20 }
 0x157   : > { %v1902_v32 = vpop.eup %1901  ;;  %v461_v34 = vadd.f32 %v1676_v27, %v447_v30  ;;  %v437_v35 = vmul.f32 %v1900_v31, %v2100_v29 }
 0x158   : > { %v434_v37 = vmul.f32 %v1902_v32, %v2108_v38  ;;  %v464_v44 = vadd.f32 %v1676_v27, %v450_v36 }
 0x159   : > { %v468_v40 = vpack.c.bf16 %v461_v34, %v460_v33  ;;  %v451_v28 = vmul.f32 %v1675_v19, %v437_v35 }
 0x15a   : > { %v1904_v41 = vpop.eup %1903  ;;  %v448_v45 = vmul.f32 %v1675_v19, %v434_v37 }
 0x15b   : > { %v1906_v42 = vpop.eup %1905  ;;  %v435_v43 = vmul.f32 %v1904_v41, %v2110_v39  ;;  %1812 = vmatprep.mubr.msk.bf16.mxu0 %vm334_vm0, %v468_v40  ;;  %v465_v21 = vadd.f32 %v1676_v27, %v451_v28 }
 0x15c   : > { %v438_v46 = vmul.f32 %v1906_v42, %v2118_v48  ;;  %v462_v38 = vadd.f32 %v1676_v27, %v448_v45  ;;  %v1677_v48 = vld [vmem:[%s2646_s4] ss:$0 sm:$0xff] }
 0x15d   : > { %v470_v47 = vpack.c.bf16 %v465_v21, %v464_v44  ;;  %v449_v50 = vmul.f32 %v1675_v19, %v435_v43 }
 0x15e   : > { %v1908_v29 = vpop.eup %1907  ;;  %v452_v53 = vmul.f32 %v1675_v19, %v438_v46 }
 0x15f   : > { %v439_v51 = vmul.f32 %v1908_v29, %v2120_v49  ;;  %1816 = vmatprep.mubr.msk.bf16.mxu1 %vm334_vm0, %v470_v47  ;;  %v463_v52 = vadd.f32 %v1676_v27, %v449_v50 }
 0x160   : > { %v466_v55 = vadd.f32 %v1676_v27, %v452_v53 }
 0x161   : > { %v469_v54 = vpack.c.bf16 %v463_v52, %v462_v38  ;;  %v453_v39 = vmul.f32 %v1675_v19, %v439_v51 }
 0x163   : > { %1813 = vmatmul.mubr.msk.bf16.vlgmr.msra.gmra.mrb[0].mxu0 %vm334_vm0, %v469_v54  ;;  %v467_v56 = vadd.f32 %v1676_v27, %v453_v39 }
 0x165   : > { %v471_v57 = vpack.c.bf16 %v467_v56, %v466_v55 }
 0x167   : > { %1817 = vmatmul.mubr.msk.bf16.vlgmr.msra.gmra.mrb[0].mxu1 %vm334_vm0, %v471_v57 }
 0x236   : > { %v1814_v49 = vpop.f32.mrb[0].mxu0 }
 0x237   : > { %v550_v58 = vadd.f32 %v1814_v49, %v1677_v48  ;;  %v541_v59 = vpop.f32.mrb[1].mxu0 }
 0x238   : > { %v2160_v60 = vadd.f32 %v1677_v48, %v541_v59  ;;  %v1815_v61 = vpop.f32.mrb[2].mxu0 }
 0x239   : > { %v574_v62 = vmul.f32 0.35355338, %v550_v58  ;;  %v2162_v63 = vpack.c.bf16 %v550_v58, %v550_v58  ;;  %v553_v0 = vadd.f32 %v1815_v61, %v1677_v48  ;;  %v544_v1 = vpop.f32.mrb[3].mxu0 }
 0x23a   : > { %v572_v2 = vmul.f32 0.35355338, %v2160_v60  ;;  %v2165_v3 = vadd.f32 %v1677_v48, %v544_v1  ;;  %v1818_v4 = vpop.f32.mrb[0].mxu1  ;;  %v1794_v32 = vpack.c.bf16 %v2160_v60, %v2160_v60 }
 0x23b   : > { %v2167_v5 = vpack.c.bf16 %v574_v62, %v574_v62  ;;  %v575_v6 = vmul.f32 0.35355338, %v553_v0  ;;  %v566_v7 = vadd.f32 %v1818_v4, %v1677_v48  ;;  %649 = vrot.lane.b32.xlu1 %v2162_v63, %s1965_s24  ;;  %v557_v8 = vpop.f32.mrb[1].mxu1  ;;  %v2173_v10 = vpack.c.bf16 %v553_v0, %v553_v0 }
 0x23c   : > { %v2171_v9 = vpack.c.bf16 %v572_v2, %v572_v2  ;;  %v573_v11 = vmul.f32 0.35355338, %v2165_v3  ;;  %v2176_v12 = vadd.f32 %v1677_v48, %v557_v8  ;;  %v1819_v13 = vpop.f32.mrb[2].mxu1  ;;  %v1795_v33 = vpack.c.bf16 %v2165_v3, %v2165_v3 }
 0x23d   : > { %615 = vst.msk [vmem:[%s2179_s26 + $0x8] sm:$0xf] %vm612_vm1, %v2167_v5  ;;  %v2184_v14 = vpack.c.bf16 %v575_v6, %v575_v6  ;;  %v578_v15 = vmul.f32 0.35355338, %v566_v7  ;;  %v2186_v16 = vpack.c.bf16 %v566_v7, %v566_v7  ;;  %v569_v17 = vadd.f32 %v1819_v13, %v1677_v48  ;;  %v560_v18 = vpop.f32.mrb[3].mxu1 }
 0x23e   : > { %613 = vst.msk [vmem:[%s2179_s26] sm:$0xf] %vm612_vm1, %v2171_v9  ;;  %v2191_v19 = vpack.c.bf16 %v573_v11, %v573_v11  ;;  %v576_v22 = vmul.f32 0.35355338, %v2176_v12  ;;  %v561_v23 = vadd.f32 %v1677_v48, %v560_v18  ;;  %v1798_v34 = vpack.c.bf16 %v2176_v12, %v2176_v12 }
 0x23f   : > { %616 = vst.msk [vmem:[%s2179_s26 + $0xc] sm:$0xf] %vm612_vm1, %v2184_v14  ;;  %v2197_v24 = vpack.c.bf16 %v578_v15, %v578_v15  ;;  %v579_v25 = vmul.f32 0.35355338, %v569_v17  ;;  %651 = vrot.lane.b32.xlu1 %v2173_v10, %s1965_s24  ;;  %657 = vrot.lane.b32.xlu0 %v2186_v16, %s1965_s24  ;;  %v2213_v30 = vpack.c.bf16 %v569_v17, %v569_v17 }
 0x240   : > { %614 = vst.msk [vmem:[%s2179_s26 + $0x4] sm:$0xf] %vm612_vm1, %v2191_v19  ;;  %v2206_v26 = vpack.c.bf16 %v576_v22, %v576_v22  ;;  %v577_v27 = vmul.f32 0.35355338, %v561_v23  ;;  %v1799_v35 = vpack.c.bf16 %v561_v23, %v561_v23 }
 0x241   : > { %619 = vst.msk [vmem:[%s2179_s26 + $0x18] sm:$0xf] %vm612_vm1, %v2197_v24  ;;  %v2211_v20 = vpack.c.bf16 %v579_v25, %v579_v25 }
 0x242   : > { %617 = vst.msk [vmem:[%s2179_s26 + $0x10] sm:$0xf] %vm612_vm1, %v2206_v26  ;;  %v2218_v31 = vpack.c.bf16 %v577_v27, %v577_v27 }
 0x243   : > { %620 = vst.msk [vmem:[%s2179_s26 + $0x1c] sm:$0xf] %vm612_vm1, %v2211_v20  ;;  %681 = vrot.lane.b32.xlu0 %v2162_v63, %s1966_s13  ;;  %659 = vrot.lane.b32.xlu1 %v2213_v30, %s1965_s24 }
 0x244   : > { %618 = vst.msk [vmem:[%s2179_s26 + $0x14] sm:$0xf] %vm612_vm1, %v2218_v31 }
 0x247   : > { %689 = vrot.lane.b32.xlu0 %v2186_v16, %s1966_s13  ;;  %683 = vrot.lane.b32.xlu1 %v2173_v10, %s1966_s13 }
 0x24b   : > { %746 = vrot.lane.b32.xlu0 %v2162_v63, %s1967_s14  ;;  %691 = vrot.lane.b32.xlu1 %v2213_v30, %s1966_s13 }
 0x24f   : > { %754 = vrot.lane.b32.xlu0 %v2186_v16, %s1967_s14  ;;  %748 = vrot.lane.b32.xlu1 %v2173_v10, %s1967_s14 }
 0x253   : > { %779 = vrot.lane.b32.xlu0 %v2162_v63, %s1968_s15  ;;  %756 = vrot.lane.b32.xlu1 %v2213_v30, %s1967_s14 }
 0x257   : > { %787 = vrot.lane.b32.xlu0 %v2186_v16, %s1968_s15  ;;  %781 = vrot.lane.b32.xlu1 %v2173_v10, %s1968_s15 }
 0x25b   : > { %845 = vrot.lane.b32.xlu0 %v2162_v63, %s1969_s18  ;;  %789 = vrot.lane.b32.xlu1 %v2213_v30, %s1968_s15 }
 0x25f   : > { %853 = vrot.lane.b32.xlu0 %v2186_v16, %s1969_s18  ;;  %847 = vrot.lane.b32.xlu1 %v2173_v10, %s1969_s18 }
 0x263   : > { %878 = vrot.lane.b32.xlu0 %v2162_v63, %s1970_s19  ;;  %855 = vrot.lane.b32.xlu1 %v2213_v30, %s1969_s18 }
 0x267   : > { %886 = vrot.lane.b32.xlu0 %v2186_v16, %s1970_s19  ;;  %880 = vrot.lane.b32.xlu1 %v2173_v10, %s1970_s19 }
 0x26b   : > { %944 = vrot.lane.b32.xlu0 %v2162_v63, %s1971_s20  ;;  %888 = vrot.lane.b32.xlu1 %v2213_v30, %s1970_s19 }
 0x26f   : > { %952 = vrot.lane.b32.xlu0 %v2186_v16, %s1971_s20  ;;  %946 = vrot.lane.b32.xlu1 %v2173_v10, %s1971_s20 }
 0x273   : > { %977 = vrot.lane.b32.xlu0 %v2162_v63, %s1972_s21  ;;  %954 = vrot.lane.b32.xlu1 %v2213_v30, %s1971_s20 }
 0x277   : > { %645 = vrot.lane.b32.xlu0 %v1794_v32, %s1965_s24  ;;  %979 = vrot.lane.b32.xlu1 %v2173_v10, %s1972_s21 }
 0x27b   : > { %647 = vrot.lane.b32.xlu1 %v1795_v33, %s1965_s24  ;;  %653 = vrot.lane.b32.xlu0 %v1798_v34, %s1965_s24 }
 0x27f   : > { %655 = vrot.lane.b32.xlu1 %v1799_v35, %s1965_s24  ;;  %677 = vrot.lane.b32.xlu0 %v1794_v32, %s1966_s13  ;;  %s1975_s24 = smov 104  }
 0x283   : > { %679 = vrot.lane.b32.xlu1 %v1795_v33, %s1966_s13  ;;  %685 = vrot.lane.b32.xlu0 %v1798_v34, %s1966_s13 }
 0x287   : > { %687 = vrot.lane.b32.xlu1 %v1799_v35, %s1966_s13  ;;  %742 = vrot.lane.b32.xlu0 %v1794_v32, %s1967_s14  ;;  %s1776_s13 = sshll.u32 (%p2060_p5), %s1951_s27, 6 }
 0x28b   : > { %744 = vrot.lane.b32.xlu1 %v1795_v33, %s1967_s14  ;;  %750 = vrot.lane.b32.xlu0 %v1798_v34, %s1967_s14 }
 0x28f   : > { %752 = vrot.lane.b32.xlu1 %v1799_v35, %s1967_s14  ;;  %775 = vrot.lane.b32.xlu0 %v1794_v32, %s1968_s15  ;;  %s1023_s14 = sadd.s32 (%p2060_p5), %s1776_s13, %s2073_s17 }
 0x293   : > { %777 = vrot.lane.b32.xlu1 %v1795_v33, %s1968_s15  ;;  %783 = vrot.lane.b32.xlu0 %v1798_v34, %s1968_s15 }
 0x297   : > { %785 = vrot.lane.b32.xlu1 %v1799_v35, %s1968_s15  ;;  %841 = vrot.lane.b32.xlu0 %v1794_v32, %s1969_s18  ;;  %s1777_s15 = sshll.u32 (%p2060_p5), %s1023_s14, 2 }
 0x29b   : > { %843 = vrot.lane.b32.xlu1 %v1795_v33, %s1969_s18  ;;  %849 = vrot.lane.b32.xlu0 %v1798_v34, %s1969_s18 }
 0x29f   : > { %851 = vrot.lane.b32.xlu1 %v1799_v35, %s1969_s18  ;;  %874 = vrot.lane.b32.xlu0 %v1794_v32, %s1970_s19 }
 0x2a3   : > { %876 = vrot.lane.b32.xlu1 %v1795_v33, %s1970_s19  ;;  %882 = vrot.lane.b32.xlu0 %v1798_v34, %s1970_s19 }
 0x2a7   : > { %884 = vrot.lane.b32.xlu1 %v1799_v35, %s1970_s19  ;;  %940 = vrot.lane.b32.xlu0 %v1794_v32, %s1971_s20 }
 0x2ab   : > { %942 = vrot.lane.b32.xlu1 %v1795_v33, %s1971_s20  ;;  %948 = vrot.lane.b32.xlu0 %v1798_v34, %s1971_s20 }
 0x2ad   : > { %v650_v36 = vpop.permute.xlu1 %649 }
 0x2ae   : > { %671 = vst.msk [vmem:[%s2314_s22 + $0x8] sm:$0xf] %vm612_vm1, %v650_v36 }
 0x2af   : > { %950 = vrot.lane.b32.xlu1 %v1799_v35, %s1971_s20  ;;  %973 = vrot.lane.b32.xlu0 %v1794_v32, %s1972_s21  ;;  %s1025_s20 = scalar_lea.vmem (%p2060_p5), %s2647_s5, %s1777_s15 }
 0x2b1   : > { %v652_v37 = vpop.permute.xlu1 %651  ;;  %v658_v40 = vpop.permute.xlu0 %657 }
 0x2b2   : > { %672 = vst.msk [vmem:[%s2314_s22 + $0xc] sm:$0xf] %vm612_vm1, %v652_v37  ;;  %675 = vst.msk [vmem:[%s2314_s22 + $0x18] sm:$0xf] %vm612_vm1, %v658_v40 }
 0x2b3   : > { %975 = vrot.lane.b32.xlu1 %v1795_v33, %s1972_s21  ;;  %981 = vrot.lane.b32.xlu0 %v1798_v34, %s1972_s21 }
 0x2b5   : > { %v682_v28 = vpop.permute.xlu0 %681  ;;  %v660_v41 = vpop.permute.xlu1 %659 }
 0x2b6   : > { %703 = vst.msk [vmem:[%s2327_s23 + $0x8] sm:$0xf] %vm612_vm1, %v682_v28  ;;  %676 = vst.msk [vmem:[%s2314_s22 + $0x1c] sm:$0xf] %vm612_vm1, %v660_v41 }
 0x2b7   : > { %983 = vrot.lane.b32.xlu1 %v1799_v35, %s1972_s21  ;;  %713 = vrot.lane.b32.xlu0 %v2167_v5, %s1973_s10 }
 0x2b9   : > { %v690_v42 = vpop.permute.xlu0 %689  ;;  %v684_v43 = vpop.permute.xlu1 %683 }
 0x2ba   : > { %707 = vst.msk [vmem:[%s2327_s23 + $0x18] sm:$0xf] %vm612_vm1, %v690_v42  ;;  %704 = vst.msk [vmem:[%s2327_s23 + $0xc] sm:$0xf] %vm612_vm1, %v684_v43 }
 0x2bb   : > { %715 = vrot.lane.b32.xlu1 %v2184_v14, %s1973_s10  ;;  %721 = vrot.lane.b32.xlu0 %v2197_v24, %s1973_s10 }
 0x2bd   : > { %v747_v44 = vpop.permute.xlu0 %746  ;;  %v692_v21 = vpop.permute.xlu1 %691 }
 0x2be   : > { %1710 = vst.msk [vmem:[%s2314_s22 + $0x28] sm:$0xf] %vm612_vm1, %v747_v44  ;;  %708 = vst.msk [vmem:[%s2327_s23 + $0x1c] sm:$0xf] %vm612_vm1, %v692_v21 }
 0x2bf   : > { %723 = vrot.lane.b32.xlu1 %v2211_v20, %s1973_s10  ;;  %812 = vrot.lane.b32.xlu0 %v2167_v5, %s1974_s11 }
 0x2c1   : > { %v755_v45 = vpop.permute.xlu0 %754  ;;  %v749_v46 = vpop.permute.xlu1 %748 }
 0x2c2   : > { %1714 = vst.msk [vmem:[%s2314_s22 + $0x38] sm:$0xf] %vm612_vm1, %v755_v45  ;;  %1711 = vst.msk [vmem:[%s2314_s22 + $0x2c] sm:$0xf] %vm612_vm1, %v749_v46 }
 0x2c3   : > { %814 = vrot.lane.b32.xlu1 %v2184_v14, %s1974_s11  ;;  %820 = vrot.lane.b32.xlu0 %v2197_v24, %s1974_s11 }
 0x2c5   : > { %v780_v47 = vpop.permute.xlu0 %779  ;;  %v757_v50 = vpop.permute.xlu1 %756 }
 0x2c6   : > { %1718 = vst.msk [vmem:[%s2327_s23 + $0x28] sm:$0xf] %vm612_vm1, %v780_v47  ;;  %1715 = vst.msk [vmem:[%s2314_s22 + $0x3c] sm:$0xf] %vm612_vm1, %v757_v50 }
 0x2c7   : > { %822 = vrot.lane.b32.xlu1 %v2211_v20, %s1974_s11  ;;  %911 = vrot.lane.b32.xlu0 %v2167_v5, %s1975_s24 }
 0x2c9   : > { %v788_v29 = vpop.permute.xlu0 %787  ;;  %v782_v51 = vpop.permute.xlu1 %781 }
 0x2ca   : > { %1722 = vst.msk [vmem:[%s2327_s23 + $0x38] sm:$0xf] %vm612_vm1, %v788_v29  ;;  %1719 = vst.msk [vmem:[%s2327_s23 + $0x2c] sm:$0xf] %vm612_vm1, %v782_v51 }
 0x2cb   : > { %913 = vrot.lane.b32.xlu1 %v2184_v14, %s1975_s24  ;;  %919 = vrot.lane.b32.xlu0 %v2197_v24, %s1975_s24 }
 0x2cd   : > { %v846_v38 = vpop.permute.xlu0 %845  ;;  %v790_v52 = vpop.permute.xlu1 %789 }
 0x2ce   : > { %1734 = vst.msk [vmem:[%s2314_s22 + $0x48] sm:$0xf] %vm612_vm1, %v846_v38  ;;  %1723 = vst.msk [vmem:[%s2327_s23 + $0x3c] sm:$0xf] %vm612_vm1, %v790_v52 }
 0x2cf   : > { %921 = vrot.lane.b32.xlu1 %v2211_v20, %s1975_s24  ;;  %709 = vrot.lane.b32.xlu0 %v2171_v9, %s1973_s10 }
 0x2d1   : > { %v854_v53 = vpop.permute.xlu0 %853  ;;  %v848_v54 = vpop.permute.xlu1 %847 }
 0x2d2   : > { %1738 = vst.msk [vmem:[%s2314_s22 + $0x58] sm:$0xf] %vm612_vm1, %v854_v53  ;;  %1735 = vst.msk [vmem:[%s2314_s22 + $0x4c] sm:$0xf] %vm612_vm1, %v848_v54 }
 0x2d3   : > { %711 = vrot.lane.b32.xlu1 %v2191_v19, %s1973_s10  ;;  %717 = vrot.lane.b32.xlu0 %v2206_v26, %s1973_s10 }
 0x2d5   : > { %v879_v39 = vpop.permute.xlu0 %878  ;;  %v856_v55 = vpop.permute.xlu1 %855 }
 0x2d6   : > { %1742 = vst.msk [vmem:[%s2327_s23 + $0x48] sm:$0xf] %vm612_vm1, %v879_v39  ;;  %1739 = vst.msk [vmem:[%s2314_s22 + $0x5c] sm:$0xf] %vm612_vm1, %v856_v55 }
 0x2d7   : > { %719 = vrot.lane.b32.xlu1 %v2218_v31, %s1973_s10  ;;  %808 = vrot.lane.b32.xlu0 %v2171_v9, %s1974_s11 }
 0x2d9   : > { %v887_v56 = vpop.permute.xlu0 %886  ;;  %v881_v57 = vpop.permute.xlu1 %880 }
 0x2da   : > { %1746 = vst.msk [vmem:[%s2327_s23 + $0x58] sm:$0xf] %vm612_vm1, %v887_v56  ;;  %1743 = vst.msk [vmem:[%s2327_s23 + $0x4c] sm:$0xf] %vm612_vm1, %v881_v57 }
 0x2db   : > { %810 = vrot.lane.b32.xlu1 %v2191_v19, %s1974_s11  ;;  %816 = vrot.lane.b32.xlu0 %v2206_v26, %s1974_s11 }
 0x2dd   : > { %v945_v48 = vpop.permute.xlu0 %944  ;;  %v889_v49 = vpop.permute.xlu1 %888 }
 0x2de   : > { %1758 = vst.msk [vmem:[%s2314_s22 + $0x68] sm:$0xf] %vm612_vm1, %v945_v48  ;;  %1747 = vst.msk [vmem:[%s2327_s23 + $0x5c] sm:$0xf] %vm612_vm1, %v889_v49  ;;  %v1041_v49 = vld [vmem:[%s2179_s26] sm:$0xff] (%p2060_p5)  }
 0x2df   : > { %818 = vrot.lane.b32.xlu1 %v2218_v31, %s1974_s11  ;;  %907 = vrot.lane.b32.xlu0 %v2171_v9, %s1975_s24  ;;  %1042 = vst [vmem:[%s1025_s20] sm:$0xff] (%p2060_p5), %v1041_v49  }
 0x2e1   : > { %v953_v58 = vpop.permute.xlu0 %952  ;;  %v947_v59 = vpop.permute.xlu1 %946 }
 0x2e2   : > { %1762 = vst.msk [vmem:[%s2314_s22 + $0x78] sm:$0xf] %vm612_vm1, %v953_v58  ;;  %1759 = vst.msk [vmem:[%s2314_s22 + $0x6c] sm:$0xf] %vm612_vm1, %v947_v59  ;;  %v1045_v58 = vld [vmem:[%s2179_s26 + $0x8] sm:$0xff] (%p2060_p5)   ;;  %v1049_v59 = vld [vmem:[%s2179_s26 + $0x10] sm:$0xff] (%p2060_p5)  }
 0x2e3   : > { %909 = vrot.lane.b32.xlu1 %v2191_v19, %s1975_s24  ;;  %915 = vrot.lane.b32.xlu0 %v2206_v26, %s1975_s24  ;;  %1046 = vst [vmem:[%s1025_s20 + $0x8] sm:$0xff] (%p2060_p5), %v1045_v58   ;;  %1050 = vst [vmem:[%s1025_s20 + $0x10] sm:$0xff] (%p2060_p5), %v1049_v59  }
 0x2e5   : > { %v978_v60 = vpop.permute.xlu0 %977  ;;  %v955_v61 = vpop.permute.xlu1 %954 }
 0x2e6   : > { %1766 = vst.msk [vmem:[%s2327_s23 + $0x68] sm:$0xf] %vm612_vm1, %v978_v60  ;;  %1763 = vst.msk [vmem:[%s2314_s22 + $0x7c] sm:$0xf] %vm612_vm1, %v955_v61  ;;  %v1053_v60 = vld [vmem:[%s2179_s26 + $0x18] sm:$0xff] (%p2060_p5)  }
 0x2e7   : > { %917 = vrot.lane.b32.xlu1 %v2218_v31, %s1975_s24  ;;  %985 = vrot.lane.b32.xlu0 %v2186_v16, %s1972_s21  ;;  %1054 = vst [vmem:[%s1025_s20 + $0x18] sm:$0xff] (%p2060_p5), %v1053_v60  }
 0x2e9   : > { %v646_v62 = vpop.permute.xlu0 %645  ;;  %v980_v63 = vpop.permute.xlu1 %979 }
 0x2ea   : > { %669 = vst.msk [vmem:[%s2314_s22] sm:$0xf] %vm612_vm1, %v646_v62  ;;  %1767 = vst.msk [vmem:[%s2327_s23 + $0x6c] sm:$0xf] %vm612_vm1, %v980_v63 }
 0x2eb   : > { %987 = vrot.lane.b32.xlu1 %v2213_v30, %s1972_s21 }
 0x2ed   : > { %v648_v0 = vpop.permute.xlu1 %647  ;;  %v654_v1 = vpop.permute.xlu0 %653 }
 0x2ee   : > { %670 = vst.msk [vmem:[%s2314_s22 + $0x4] sm:$0xf] %vm612_vm1, %v648_v0  ;;  %673 = vst.msk [vmem:[%s2314_s22 + $0x10] sm:$0xf] %vm612_vm1, %v654_v1 }
 0x2f1   : > { %v656_v2 = vpop.permute.xlu1 %655  ;;  %v678_v3 = vpop.permute.xlu0 %677 }
 0x2f2   : > { %674 = vst.msk [vmem:[%s2314_s22 + $0x14] sm:$0xf] %vm612_vm1, %v656_v2  ;;  %701 = vst.msk [vmem:[%s2327_s23] sm:$0xf] %vm612_vm1, %v678_v3 }
 0x2f5   : > { %v680_v4 = vpop.permute.xlu1 %679  ;;  %v686_v5 = vpop.permute.xlu0 %685 }
 0x2f6   : > { %702 = vst.msk [vmem:[%s2327_s23 + $0x4] sm:$0xf] %vm612_vm1, %v680_v4  ;;  %705 = vst.msk [vmem:[%s2327_s23 + $0x10] sm:$0xf] %vm612_vm1, %v686_v5 }
 0x2f9   : > { %v688_v6 = vpop.permute.xlu1 %687  ;;  %v743_v7 = vpop.permute.xlu0 %742 }
 0x2fa   : > { %706 = vst.msk [vmem:[%s2327_s23 + $0x14] sm:$0xf] %vm612_vm1, %v688_v6  ;;  %1708 = vst.msk [vmem:[%s2314_s22 + $0x20] sm:$0xf] %vm612_vm1, %v743_v7 }
 0x2fd   : > { %v745_v8 = vpop.permute.xlu1 %744  ;;  %v751_v9 = vpop.permute.xlu0 %750 }
 0x2fe   : > { %1709 = vst.msk [vmem:[%s2314_s22 + $0x24] sm:$0xf] %vm612_vm1, %v745_v8  ;;  %1712 = vst.msk [vmem:[%s2314_s22 + $0x30] sm:$0xf] %vm612_vm1, %v751_v9 }
 0x301   : > { %v753_v10 = vpop.permute.xlu1 %752  ;;  %v776_v11 = vpop.permute.xlu0 %775 }
 0x302   : > { %1713 = vst.msk [vmem:[%s2314_s22 + $0x34] sm:$0xf] %vm612_vm1, %v753_v10  ;;  %1716 = vst.msk [vmem:[%s2327_s23 + $0x20] sm:$0xf] %vm612_vm1, %v776_v11 }
 0x305   : > { %v778_v12 = vpop.permute.xlu1 %777  ;;  %v784_v13 = vpop.permute.xlu0 %783 }
 0x306   : > { %1717 = vst.msk [vmem:[%s2327_s23 + $0x24] sm:$0xf] %vm612_vm1, %v778_v12  ;;  %1720 = vst.msk [vmem:[%s2327_s23 + $0x30] sm:$0xf] %vm612_vm1, %v784_v13 }
 0x309   : > { %v786_v14 = vpop.permute.xlu1 %785  ;;  %v842_v15 = vpop.permute.xlu0 %841 }
 0x30a   : > { %1721 = vst.msk [vmem:[%s2327_s23 + $0x34] sm:$0xf] %vm612_vm1, %v786_v14  ;;  %1732 = vst.msk [vmem:[%s2314_s22 + $0x40] sm:$0xf] %vm612_vm1, %v842_v15 }
 0x30d   : > { %v844_v16 = vpop.permute.xlu1 %843  ;;  %v850_v17 = vpop.permute.xlu0 %849 }
 0x30e   : > { %1733 = vst.msk [vmem:[%s2314_s22 + $0x44] sm:$0xf] %vm612_vm1, %v844_v16  ;;  %1736 = vst.msk [vmem:[%s2314_s22 + $0x50] sm:$0xf] %vm612_vm1, %v850_v17 }
 0x311   : > { %v852_v18 = vpop.permute.xlu1 %851  ;;  %v875_v19 = vpop.permute.xlu0 %874 }
 0x312   : > { %1737 = vst.msk [vmem:[%s2314_s22 + $0x54] sm:$0xf] %vm612_vm1, %v852_v18  ;;  %1740 = vst.msk [vmem:[%s2327_s23 + $0x40] sm:$0xf] %vm612_vm1, %v875_v19 }
 0x315   : > { %v877_v22 = vpop.permute.xlu1 %876  ;;  %v883_v23 = vpop.permute.xlu0 %882 }
 0x316   : > { %1741 = vst.msk [vmem:[%s2327_s23 + $0x44] sm:$0xf] %vm612_vm1, %v877_v22  ;;  %1744 = vst.msk [vmem:[%s2327_s23 + $0x50] sm:$0xf] %vm612_vm1, %v883_v23 }
 0x319   : > { %v885_v24 = vpop.permute.xlu1 %884  ;;  %v941_v25 = vpop.permute.xlu0 %940 }
 0x31a   : > { %1745 = vst.msk [vmem:[%s2327_s23 + $0x54] sm:$0xf] %vm612_vm1, %v885_v24  ;;  %1756 = vst.msk [vmem:[%s2314_s22 + $0x60] sm:$0xf] %vm612_vm1, %v941_v25 }
 0x31d   : > { %v943_v26 = vpop.permute.xlu1 %942  ;;  %v949_v27 = vpop.permute.xlu0 %948 }
 0x31e   : > { %1757 = vst.msk [vmem:[%s2314_s22 + $0x64] sm:$0xf] %vm612_vm1, %v943_v26  ;;  %1760 = vst.msk [vmem:[%s2314_s22 + $0x70] sm:$0xf] %vm612_vm1, %v949_v27 }
 0x321   : > { %v951_v20 = vpop.permute.xlu1 %950  ;;  %v974_v30 = vpop.permute.xlu0 %973 }
 0x322   : > { %1761 = vst.msk [vmem:[%s2314_s22 + $0x74] sm:$0xf] %vm612_vm1, %v951_v20  ;;  %1764 = vst.msk [vmem:[%s2327_s23 + $0x60] sm:$0xf] %vm612_vm1, %v974_v30 }
 0x325   : > { %v976_v31 = vpop.permute.xlu1 %975  ;;  %v982_v32 = vpop.permute.xlu0 %981 }
 0x326   : > { %1765 = vst.msk [vmem:[%s2327_s23 + $0x64] sm:$0xf] %vm612_vm1, %v976_v31  ;;  %1768 = vst.msk [vmem:[%s2327_s23 + $0x70] sm:$0xf] %vm612_vm1, %v982_v32 }
 0x329   : > { %v984_v33 = vpop.permute.xlu1 %983  ;;  %v714_v34 = vpop.permute.xlu0 %713 }
 0x32a   : > { %1769 = vst.msk [vmem:[%s2327_s23 + $0x74] sm:$0xf] %vm612_vm1, %v984_v33  ;;  %1702 = vst.msk [vmem:[%s2179_s26 + $0x28] sm:$0xf] %vm612_vm1, %v714_v34 }
 0x32d   : > { %v716_v35 = vpop.permute.xlu1 %715  ;;  %v722_v36 = vpop.permute.xlu0 %721 }
 0x32e   : > { %1703 = vst.msk [vmem:[%s2179_s26 + $0x2c] sm:$0xf] %vm612_vm1, %v716_v35  ;;  %1706 = vst.msk [vmem:[%s2179_s26 + $0x38] sm:$0xf] %vm612_vm1, %v722_v36 }
 0x331   : > { %v724_v37 = vpop.permute.xlu1 %723  ;;  %v813_v40 = vpop.permute.xlu0 %812 }
 0x332   : > { %1707 = vst.msk [vmem:[%s2179_s26 + $0x3c] sm:$0xf] %vm612_vm1, %v724_v37  ;;  %1726 = vst.msk [vmem:[%s2179_s26 + $0x48] sm:$0xf] %vm612_vm1, %v813_v40 }
 0x335   : > { %v815_v28 = vpop.permute.xlu1 %814  ;;  %v821_v41 = vpop.permute.xlu0 %820  ;;  %v1061_v62 = vld [vmem:[%s2179_s26 + $0x28] sm:$0xff] (%p2060_p5)  }
 0x336   : > { %1727 = vst.msk [vmem:[%s2179_s26 + $0x4c] sm:$0xf] %vm612_vm1, %v815_v28  ;;  %1730 = vst.msk [vmem:[%s2179_s26 + $0x58] sm:$0xf] %vm612_vm1, %v821_v41 }
 0x337   : > { %1062 = vst [vmem:[%s1025_s20 + $0x48] sm:$0xff] (%p2060_p5), %v1061_v62  }
 0x339   : > { %v823_v42 = vpop.permute.xlu1 %822  ;;  %v912_v43 = vpop.permute.xlu0 %911  ;;  %v1069_v0 = vld [vmem:[%s2179_s26 + $0x38] sm:$0xff] (%p2060_p5)  }
 0x33a   : > { %1731 = vst.msk [vmem:[%s2179_s26 + $0x5c] sm:$0xf] %vm612_vm1, %v823_v42  ;;  %1750 = vst.msk [vmem:[%s2179_s26 + $0x68] sm:$0xf] %vm612_vm1, %v912_v43 }
 0x33b   : > { %1070 = vst [vmem:[%s1025_s20 + $0x58] sm:$0xff] (%p2060_p5), %v1069_v0  }
 0x33d   : > { %v914_v44 = vpop.permute.xlu1 %913  ;;  %v920_v21 = vpop.permute.xlu0 %919  ;;  %v1077_v2 = vld [vmem:[%s2179_s26 + $0x48] sm:$0xff] (%p2060_p5)  }
 0x33e   : > { %1751 = vst.msk [vmem:[%s2179_s26 + $0x6c] sm:$0xf] %vm612_vm1, %v914_v44  ;;  %1754 = vst.msk [vmem:[%s2179_s26 + $0x78] sm:$0xf] %vm612_vm1, %v920_v21 }
 0x33f   : > { %1078 = vst [vmem:[%s1025_s20 + $0x88] sm:$0xff] (%p2060_p5), %v1077_v2  }
 0x341   : > { %v922_v45 = vpop.permute.xlu1 %921  ;;  %v710_v46 = vpop.permute.xlu0 %709  ;;  %v1085_v4 = vld [vmem:[%s2179_s26 + $0x58] sm:$0xff] (%p2060_p5)  }
 0x342   : > { %1755 = vst.msk [vmem:[%s2179_s26 + $0x7c] sm:$0xf] %vm612_vm1, %v922_v45  ;;  %1700 = vst.msk [vmem:[%s2179_s26 + $0x20] sm:$0xf] %vm612_vm1, %v710_v46 }
 0x343   : > { %1086 = vst [vmem:[%s1025_s20 + $0x98] sm:$0xff] (%p2060_p5), %v1085_v4  }
 0x345   : > { %v712_v47 = vpop.permute.xlu1 %711  ;;  %v718_v50 = vpop.permute.xlu0 %717  ;;  %v1093_v6 = vld [vmem:[%s2179_s26 + $0x68] sm:$0xff] (%p2060_p5)  }
 0x346   : > { %1701 = vst.msk [vmem:[%s2179_s26 + $0x24] sm:$0xf] %vm612_vm1, %v712_v47  ;;  %1704 = vst.msk [vmem:[%s2179_s26 + $0x30] sm:$0xf] %vm612_vm1, %v718_v50 }
 0x347   : > { %1094 = vst [vmem:[%s1025_s20 + $0xc8] sm:$0xff] (%p2060_p5), %v1093_v6  }
 0x349   : > { %v720_v29 = vpop.permute.xlu1 %719  ;;  %v809_v51 = vpop.permute.xlu0 %808  ;;  %v1101_v8 = vld [vmem:[%s2179_s26 + $0x78] sm:$0xff] (%p2060_p5)  }
 0x34a   : > { %1705 = vst.msk [vmem:[%s2179_s26 + $0x34] sm:$0xf] %vm612_vm1, %v720_v29  ;;  %1724 = vst.msk [vmem:[%s2179_s26 + $0x40] sm:$0xf] %vm612_vm1, %v809_v51 }
 0x34b   : > { %1102 = vst [vmem:[%s1025_s20 + $0xd8] sm:$0xff] (%p2060_p5), %v1101_v8  }
 0x34d   : > { %v811_v38 = vpop.permute.xlu1 %810  ;;  %v817_v52 = vpop.permute.xlu0 %816  ;;  %v1057_v61 = vld [vmem:[%s2179_s26 + $0x20] sm:$0xff] (%p2060_p5)  }
 0x34e   : > { %1725 = vst.msk [vmem:[%s2179_s26 + $0x44] sm:$0xf] %vm612_vm1, %v811_v38  ;;  %1728 = vst.msk [vmem:[%s2179_s26 + $0x50] sm:$0xf] %vm612_vm1, %v817_v52 }
 0x34f   : > { %1058 = vst [vmem:[%s1025_s20 + $0x40] sm:$0xff] (%p2060_p5), %v1057_v61  }
 0x351   : > { %v819_v53 = vpop.permute.xlu1 %818  ;;  %v908_v54 = vpop.permute.xlu0 %907  ;;  %v1065_v63 = vld [vmem:[%s2179_s26 + $0x30] sm:$0xff] (%p2060_p5)  }
 0x352   : > { %1729 = vst.msk [vmem:[%s2179_s26 + $0x54] sm:$0xf] %vm612_vm1, %v819_v53  ;;  %1748 = vst.msk [vmem:[%s2179_s26 + $0x60] sm:$0xf] %vm612_vm1, %v908_v54 }
 0x353   : > { %1066 = vst [vmem:[%s1025_s20 + $0x50] sm:$0xff] (%p2060_p5), %v1065_v63  }
 0x355   : > { %v910_v39 = vpop.permute.xlu1 %909  ;;  %v916_v55 = vpop.permute.xlu0 %915  ;;  %v1073_v1 = vld [vmem:[%s2179_s26 + $0x40] sm:$0xff] (%p2060_p5)  }
 0x356   : > { %1749 = vst.msk [vmem:[%s2179_s26 + $0x64] sm:$0xf] %vm612_vm1, %v910_v39  ;;  %1752 = vst.msk [vmem:[%s2179_s26 + $0x70] sm:$0xf] %vm612_vm1, %v916_v55 }
 0x357   : > { %1074 = vst [vmem:[%s1025_s20 + $0x80] sm:$0xff] (%p2060_p5), %v1073_v1  }
 0x358   : > { %1020 = sbr.rel (!%p2060_p5) target bundleno = 867 (0x363), region = 44 }
 0x359   : > { %v918_v56 = vpop.permute.xlu1 %917  ;;  %v986_v57 = vpop.permute.xlu0 %985  ;;  %v1081_v3 = vld [vmem:[%s2179_s26 + $0x50] sm:$0xff] (%p2060_p5)  }
 0x35a   : > { %1753 = vst.msk [vmem:[%s2179_s26 + $0x74] sm:$0xf] %vm612_vm1, %v918_v56  ;;  %1770 = vst.msk [vmem:[%s2327_s23 + $0x78] sm:$0xf] %vm612_vm1, %v986_v57 }
 0x35b   : > { %1082 = vst [vmem:[%s1025_s20 + $0x90] sm:$0xff] (%p2060_p5), %v1081_v3  }
 0x35d   : > { %v988_v48 = vpop.permute.xlu1 %987  ;;  %v1089_v5 = vld [vmem:[%s2179_s26 + $0x60] sm:$0xff] (%p2060_p5)  }
 0x35e   : > { %1771 = vst.msk [vmem:[%s2327_s23 + $0x7c] sm:$0xf] %vm612_vm1, %v988_v48  ;;  %1090 = vst [vmem:[%s1025_s20 + $0xc0] sm:$0xff] (%p2060_p5), %v1089_v5  }
 0x361   : > { %v1097_v7 = vld [vmem:[%s2179_s26 + $0x70] sm:$0xff]  }
 0x362   : > { %1098 = vst [vmem:[%s1025_s20 + $0xd0] sm:$0xff] %v1097_v7  }
 0x363 PF: > { %1191 = sbr.rel (!%p2060_p5) target bundleno = 879 (0x36f), region = 85  ;;  %s1779_s26 = sshll.u32 (%p2060_p5), %s1951_s27, 6  ;;  %v1212_v9 = vld [vmem:[%s2314_s22] sm:$0xff] (%p2060_p5)   ;;  %v1216_v10 = vld [vmem:[%s2314_s22 + $0x8] sm:$0xff] (%p2060_p5)   ;;  %v1220_v11 = vld [vmem:[%s2314_s22 + $0x10] sm:$0xff] (%p2060_p5)  }
 0x364   : > { %s1194_s21 = sadd.s32 (%p2060_p5), %s1779_s26, %s2073_s17  ;;  %v1224_v12 = vld [vmem:[%s2314_s22 + $0x18] sm:$0xff] (%p2060_p5)   ;;  %v1228_v13 = vld [vmem:[%s2314_s22 + $0x20] sm:$0xff] (%p2060_p5)   ;;  %v1232_v14 = vld [vmem:[%s2314_s22 + $0x28] sm:$0xff] (%p2060_p5)  }
 0x365   : > { %s1780_s10 = sshll.u32 (%p2060_p5), %s1194_s21, 2  ;;  %v1236_v15 = vld [vmem:[%s2314_s22 + $0x30] sm:$0xff] (%p2060_p5)   ;;  %v1240_v16 = vld [vmem:[%s2314_s22 + $0x38] sm:$0xff] (%p2060_p5)   ;;  %v1244_v17 = vld [vmem:[%s2314_s22 + $0x40] sm:$0xff] (%p2060_p5)  }
 0x366   : > { %s1196_s13 = scalar_lea.vmem (%p2060_p5), %s2648_s6, %s1780_s10  ;;  %v1248_v18 = vld [vmem:[%s2314_s22 + $0x48] sm:$0xff] (%p2060_p5)   ;;  %v1252_v19 = vld [vmem:[%s2314_s22 + $0x50] sm:$0xff] (%p2060_p5)   ;;  %v1256_v22 = vld [vmem:[%s2314_s22 + $0x58] sm:$0xff] (%p2060_p5)  }
 0x367   : > { %1213 = vst [vmem:[%s1196_s13] sm:$0xff] (%p2060_p5), %v1212_v9   ;;  %1217 = vst [vmem:[%s1196_s13 + $0x8] sm:$0xff] (%p2060_p5), %v1216_v10   ;;  %v1260_v23 = vld [vmem:[%s2314_s22 + $0x60] sm:$0xff] (%p2060_p5)   ;;  %v1264_v24 = vld [vmem:[%s2314_s22 + $0x68] sm:$0xff] (%p2060_p5)  }
 0x368   : > { %1221 = vst [vmem:[%s1196_s13 + $0x10] sm:$0xff] (%p2060_p5), %v1220_v11   ;;  %1225 = vst [vmem:[%s1196_s13 + $0x18] sm:$0xff] (%p2060_p5), %v1224_v12   ;;  %v1268_v25 = vld [vmem:[%s2314_s22 + $0x70] sm:$0xff] (%p2060_p5)   ;;  %v1272_v26 = vld [vmem:[%s2314_s22 + $0x78] sm:$0xff] (%p2060_p5)  }
 0x369   : > { %1229 = vst [vmem:[%s1196_s13 + $0x40] sm:$0xff] (%p2060_p5), %v1228_v13   ;;  %1233 = vst [vmem:[%s1196_s13 + $0x48] sm:$0xff] (%p2060_p5), %v1232_v14  }
 0x36a   : > { %1237 = vst [vmem:[%s1196_s13 + $0x50] sm:$0xff] %v1236_v15   ;;  %1241 = vst [vmem:[%s1196_s13 + $0x58] sm:$0xff] %v1240_v16  }
 0x36b   : > { %1245 = vst [vmem:[%s1196_s13 + $0x80] sm:$0xff] %v1244_v17   ;;  %1249 = vst [vmem:[%s1196_s13 + $0x88] sm:$0xff] %v1248_v18  }
 0x36c   : > { %1253 = vst [vmem:[%s1196_s13 + $0x90] sm:$0xff] %v1252_v19   ;;  %1257 = vst [vmem:[%s1196_s13 + $0x98] sm:$0xff] %v1256_v22  }
 0x36d   : > { %1261 = vst [vmem:[%s1196_s13 + $0xc0] sm:$0xff] %v1260_v23   ;;  %1265 = vst [vmem:[%s1196_s13 + $0xc8] sm:$0xff] %v1264_v24  }
 0x36e   : > { %1269 = vst [vmem:[%s1196_s13 + $0xd0] sm:$0xff] %v1268_v25   ;;  %1273 = vst [vmem:[%s1196_s13 + $0xd8] sm:$0xff] %v1272_v26  }
 0x36f PF: > { %1362 = sbr.rel (!%p2060_p5) target bundleno = 891 (0x37b), region = 126  ;;  %s1782_s22 = sshll.u32 (%p2060_p5), %s1951_s27, 6  ;;  %v1383_v27 = vld [vmem:[%s2327_s23] sm:$0xff] (%p2060_p5)   ;;  %v1387_v20 = vld [vmem:[%s2327_s23 + $0x8] sm:$0xff] (%p2060_p5)   ;;  %v1391_v30 = vld [vmem:[%s2327_s23 + $0x10] sm:$0xff] (%p2060_p5)  }
 0x370   : > { %s1365_s12 = sadd.s32 (%p2060_p5), %s1782_s22, %s2073_s17  ;;  %v1395_v31 = vld [vmem:[%s2327_s23 + $0x18] sm:$0xff] (%p2060_p5)   ;;  %v1399_v32 = vld [vmem:[%s2327_s23 + $0x20] sm:$0xff] (%p2060_p5)   ;;  %v1403_v33 = vld [vmem:[%s2327_s23 + $0x28] sm:$0xff] (%p2060_p5)  }
 0x371   : > { %s1783_s14 = sshll.u32 (%p2060_p5), %s1365_s12, 2  ;;  %v1407_v34 = vld [vmem:[%s2327_s23 + $0x30] sm:$0xff] (%p2060_p5)   ;;  %v1411_v35 = vld [vmem:[%s2327_s23 + $0x38] sm:$0xff] (%p2060_p5)   ;;  %v1415_v36 = vld [vmem:[%s2327_s23 + $0x40] sm:$0xff] (%p2060_p5)  }
 0x372   : > { %s1367_s19 = scalar_lea.vmem (%p2060_p5), %s2649_s7, %s1783_s14  ;;  %v1419_v37 = vld [vmem:[%s2327_s23 + $0x48] sm:$0xff] (%p2060_p5)   ;;  %v1423_v40 = vld [vmem:[%s2327_s23 + $0x50] sm:$0xff] (%p2060_p5)   ;;  %v1427_v28 = vld [vmem:[%s2327_s23 + $0x58] sm:$0xff] (%p2060_p5)  }
 0x373   : > { %1384 = vst [vmem:[%s1367_s19] sm:$0xff] (%p2060_p5), %v1383_v27   ;;  %1388 = vst [vmem:[%s1367_s19 + $0x8] sm:$0xff] (%p2060_p5), %v1387_v20   ;;  %v1431_v41 = vld [vmem:[%s2327_s23 + $0x60] sm:$0xff] (%p2060_p5)   ;;  %v1435_v42 = vld [vmem:[%s2327_s23 + $0x68] sm:$0xff] (%p2060_p5)  }
 0x374   : > { %1392 = vst [vmem:[%s1367_s19 + $0x10] sm:$0xff] (%p2060_p5), %v1391_v30   ;;  %1396 = vst [vmem:[%s1367_s19 + $0x18] sm:$0xff] (%p2060_p5), %v1395_v31   ;;  %v1439_v43 = vld [vmem:[%s2327_s23 + $0x70] sm:$0xff] (%p2060_p5)   ;;  %v1443_v44 = vld [vmem:[%s2327_s23 + $0x78] sm:$0xff] (%p2060_p5)  }
 0x375   : > { %1400 = vst [vmem:[%s1367_s19 + $0x40] sm:$0xff] (%p2060_p5), %v1399_v32   ;;  %1404 = vst [vmem:[%s1367_s19 + $0x48] sm:$0xff] (%p2060_p5), %v1403_v33  }
 0x376   : > { %1408 = vst [vmem:[%s1367_s19 + $0x50] sm:$0xff] %v1407_v34   ;;  %1412 = vst [vmem:[%s1367_s19 + $0x58] sm:$0xff] %v1411_v35  }
 0x377   : > { %1416 = vst [vmem:[%s1367_s19 + $0x80] sm:$0xff] %v1415_v36   ;;  %1420 = vst [vmem:[%s1367_s19 + $0x88] sm:$0xff] %v1419_v37  }
 0x378   : > { %1424 = vst [vmem:[%s1367_s19 + $0x90] sm:$0xff] %v1423_v40   ;;  %1428 = vst [vmem:[%s1367_s19 + $0x98] sm:$0xff] %v1427_v28  }
 0x379   : > { %1432 = vst [vmem:[%s1367_s19 + $0xc0] sm:$0xff] %v1431_v41   ;;  %1436 = vst [vmem:[%s1367_s19 + $0xc8] sm:$0xff] %v1435_v42  }
 0x37a   : > { %1440 = vst [vmem:[%s1367_s19 + $0xd0] sm:$0xff] %v1439_v43   ;;  %1444 = vst [vmem:[%s1367_s19 + $0xd8] sm:$0xff] %v1443_v44  }
 0x37b PF: > { %s18_s30 = sadd.s32 1, %s1963_s30   ;;  %s2651_s24 = smov %s1943_s25 }
 0x37c   : > { %p15_p11 = scmp.ge.s32.totalorder %s18_s30, 6   ;;  %s2652_s25 = smov %s2071_s16 }
 0x37d   : > { %s2653_s26 = smov %s1955_s28  ;;  %s2654_s27 = smov %s1959_s29 }
 0x37e   : > { %s2655_s28 = smov %s2658_s8  ;;  %s2656_s29 = smov %s2662_s9 }
 0x37f   :  { %17 = sbr.rel (!%p15_p11) target bundleno = 4 (0x4), region = 226 }

</bundles_post_ra>
